<compile_context>
chip_gen: v5e
topology: v5e:2x2
jax: 0.10.0
libtpu: 0.0.40
codegen_flags: <defaults>
</compile_context>

<pallas_src>
from functools import partial

import numpy as np
import jax
import jax.numpy as jnp
from jax.experimental import pallas as pl
from jax.experimental.pallas import tpu as pltpu

DEPTH = 2
T = 2
EPS = 1e-5


def _rrcnn_kernel(x_ref, w1_ref, b1_ref, m_ref, bk_ref, g_ref, be_ref, gsel_ref,
                  o_ref, vpad_ref, *, N, H, W, C):
    """Whole RRCNN block on (N*H, W*C) lane-dense activations.

    x_ref   : (N*H, W*Cin)             input, channels interleaved along lanes
    w1_ref  : (W*Cin, W*C)             block-diagonal 1x1-conv matrix
    b1_ref  : (1, W*C)                 1x1-conv bias tiled over W
    m_ref   : (DEPTH, 3, W*C, W*C)     banded 3x3-conv matrices, one per vertical tap
    bk_ref  : (DEPTH, 1, W*C)          3x3-conv bias tiled over W
    g_ref   : (DEPTH, 1, W*C)          BN gamma tiled over W
    be_ref  : (DEPTH, 1, W*C)          BN beta tiled over W
    gsel_ref: (W*C, W*C)               gsel[i,j] = 1 iff i%C == j%C (BN group reduce)
    o_ref   : (N*H, W*C)               output
    vpad_ref: (N, H+2, W*C)            scratch: activation padded by a zero row
    """
    NH = N * H
    WC = W * C
    inv_count = 1.0 / float(N * H * W)

    # Zero the padded scratch once; only the border rows are ever read without
    # being rewritten, but a single full clear is the cheapest correct form.
    vpad_ref[...] = jnp.zeros_like(vpad_ref)

    # 1x1 channel conv: one lane-dense MXU matmul + bias.
    h = (jnp.dot(x_ref[...], w1_ref[...], preferred_element_type=jnp.float32)
         + b1_ref[...])

    gsel = gsel_ref[...]

    for d in range(DEPTH):
        # Hoist per-depth parameters out of the t+1 block applications.
        m_up, m_mid, m_dn = m_ref[d, 0], m_ref[d, 1], m_ref[d, 2]
        bk = bk_ref[d]      # (1, WC)
        gw = g_ref[d]       # (1, WC)
        bw = be_ref[d]      # (1, WC)

        def block(v):       # v: (NH, WC) float32
            # Write the current activation into the interior of the zero-padded
            # scratch, then read the two vertically shifted windows.
            vpad_ref[:, pl.ds(1, H), :] = v.reshape(N, H, WC)
            p_up = vpad_ref[:, pl.ds(0, H), :].reshape(NH, WC)
            p_dn = vpad_ref[:, pl.ds(2, H), :].reshape(NH, WC)
            # 3x3 conv == 3 banded matmuls (horizontal taps live in the bands).
            # NOTE: operands kept in f32 for a tight numerical match; on v6e/v7x
            # casting (p_*, m_*) to bf16 is a further (minor at this size) win.
            acc = (jnp.dot(p_up, m_up, preferred_element_type=jnp.float32)
                   + jnp.dot(v,    m_mid, preferred_element_type=jnp.float32)
                   + jnp.dot(p_dn, m_dn, preferred_element_type=jnp.float32)
                   + bk)
            # BatchNorm2d (training mode), single-pass statistics:
            # row-sums of acc and acc^2, then one tiny MXU matmul with the
            # channel-group selector reduces over W and broadcasts the
            # per-channel stats back onto all 128 lanes.
            s1 = jnp.sum(acc, axis=0, keepdims=True)          # (1, WC)
            s2 = jnp.sum(acc * acc, axis=0, keepdims=True)    # (1, WC)
            stats = jnp.dot(jnp.concatenate([s1, s2], axis=0), gsel,
                            preferred_element_type=jnp.float32) * inv_count
            mean = stats[0:1]
            var = jnp.maximum(stats[1:2] - mean * mean, 0.0)  # biased variance
            scale = gw * jax.lax.rsqrt(var + EPS)             # (1, WC)
            shift = bw - mean * scale                         # (1, WC)
            return jnp.maximum(acc * scale + shift, 0.0)      # BN affine + ReLU

        new = block(h)
        for _ in range(T):
            new = block(h + new)
        h = new

    o_ref[...] = h          # lane-dense (N*H, 128) unmasked store


@jax.jit
def rrcnn_forward_nchw(x_nchw, kparams):
    """PyTorch-convention NCHW in/out; layout plumbing lives outside the kernel."""
    w1blk, b1row, m, bkrow, grow, berow, gsel = kparams
    N, Cin, H, W = x_nchw.shape
    Cout = m.shape[-1] // W

    # NCHW -> lane-dense (N*H, W*Cin)
    x2d = jnp.transpose(x_nchw, (0, 2, 3, 1)).reshape(N * H, W * Cin)

    vmem = pl.BlockSpec(memory_space=pltpu.MemorySpace.VMEM)
    kernel = partial(_rrcnn_kernel, N=N, H=H, W=W, C=Cout)
    # Single invocation, no grid: training-mode BatchNorm statistics couple every
    # (n, h, w) position, so the whole (tiny) problem is processed at once.
    # TODO(synk): for large H/W/C, tile over N*H with a halo plus a cross-tile BN
    # reduction, and set vmem_limit_bytes explicitly for v7x's 64 MiB VMEM.
    o2d = pl.pallas_call(
        kernel,
        out_shape=jax.ShapeDtypeStruct((N * H, W * Cout), jnp.float32),
        in_specs=[vmem] * 8,
        out_specs=vmem,
        scratch_shapes=[pltpu.VMEM((N, H + 2, W * Cout), jnp.float32)],
    )(x2d, w1blk, b1row, m, bkrow, grow, berow, gsel)

    # lane-dense (N*H, W*Cout) -> NCHW
    return jnp.transpose(o2d.reshape(N, H, W, Cout), (0, 3, 1, 2))


def prepare_params(w1, b1, wk, bk, gamma, beta, W):
    """Convert PyTorch-layout parameters into the kernel's lane-dense matrices.

    w1    : (Cout, Cin, 1, 1)          channel_conv weight
    b1    : (Cout,)                    channel_conv bias
    wk    : (DEPTH, Cout, Cout, 3, 3)  module_list[d] conv weights
    bk    : (DEPTH, Cout)              module_list[d] conv biases
    gamma : (DEPTH, Cout)              BN weight
    beta  : (DEPTH, Cout)              BN bias
    """
    w1 = np.asarray(w1, np.float32); b1 = np.asarray(b1, np.float32)
    wk = np.asarray(wk, np.float32); bk = np.asarray(bk, np.float32)
    gamma = np.asarray(gamma, np.float32); beta = np.asarray(beta, np.float32)
    Cout, Cin = w1.shape[0], w1.shape[1]
    WCi, WCo = W * Cin, W * Cout

    # 1x1 conv -> block-diagonal (W*Cin, W*Cout)
    w1blk = np.zeros((WCi, WCo), np.float32)
    w1m = w1[:, :, 0, 0].T                       # (Cin, Cout)
    for w in range(W):
        w1blk[w * Cin:(w + 1) * Cin, w * Cout:(w + 1) * Cout] = w1m
    b1row = np.tile(b1, W)[None, :]              # (1, W*Cout)

    # 3x3 conv -> per (depth, vertical tap kh) banded (W*Cout, W*Cout) matrix:
    # m[d, kh][wi*C + ci, wo*C + co] = wk[d, co, ci, kh, wi - wo + 1]
    m = np.zeros((DEPTH, 3, WCo, WCo), np.float32)
    for d in range(DEPTH):
        for kh in range(3):
            for kw in range(3):
                blk = wk[d, :, :, kh, kw].T      # (Cin=Cout, Cout)
                for wo in range(W):
                    wi = wo + kw - 1
                    if 0 <= wi < W:
                        m[d, kh, wi * Cout:(wi + 1) * Cout,
                                 wo * Cout:(wo + 1) * Cout] = blk

    bkrow = np.stack([np.tile(bk[d], W) for d in range(DEPTH)])[:, None, :]
    grow = np.stack([np.tile(gamma[d], W) for d in range(DEPTH)])[:, None, :]
    berow = np.stack([np.tile(beta[d], W) for d in range(DEPTH)])[:, None, :]

    # BN channel-group selector: gsel[i, j] = 1 iff i % Cout == j % Cout.
    gsel = np.tile(np.eye(Cout, dtype=np.float32), (W, W))

    return tuple(jnp.asarray(a) for a in
                 (w1blk, b1row, m, bkrow, grow, berow, gsel))


# ---------------------------------------------------------------------------
# numpy reference (float64), PyTorch layouts/semantics, for a sanity check
# ---------------------------------------------------------------------------
def ref_forward_nchw(x, w1, b1, wk, bk, gamma, beta):
    x = np.asarray(x, np.float64)
    w1 = np.asarray(w1, np.float64); b1 = np.asarray(b1, np.float64)
    wk = np.asarray(wk, np.float64); bk = np.asarray(bk, np.float64)
    gamma = np.asarray(gamma, np.float64); beta = np.asarray(beta, np.float64)
    N, Cin, H, W = x.shape
    Cout = w1.shape[0]

    def block(d, v):
        vp = np.pad(v, ((0, 0), (0, 0), (1, 1), (1, 1)))
        acc = np.zeros((N, Cout, H, W), np.float64)
        for kh in range(3):
            for kw in range(3):
                acc += np.einsum('nihw,oi->nohw',
                                 vp[:, :, kh:kh + H, kw:kw + W],
                                 wk[d, :, :, kh, kw])
        acc += bk[d].reshape(1, -1, 1, 1)
        mean = acc.mean(axis=(0, 2, 3), keepdims=True)
        var = acc.var(axis=(0, 2, 3), keepdims=True)   # biased (torch training BN)
        y = (gamma[d].reshape(1, -1, 1, 1) * (acc - mean) / np.sqrt(var + EPS)
             + beta[d].reshape(1, -1, 1, 1))
        return np.maximum(y, 0.0)

    h = np.einsum('nihw,oi->nohw', x, w1[:, :, 0, 0]) + b1.reshape(1, -1, 1, 1)
    for d in range(DEPTH):
        new = block(d, h)
        for _ in range(T):
            new = block(d, h + new)
        h = new
    return h


if __name__ == "__main__":
    N, Cin, Cout, H, W = 2, 4, 8, 16, 16        # W*Cout = 128 lanes exactly

    key = jax.random.PRNGKey(0)
    ks = jax.random.split(key, 7)

    # input and parameters in PyTorch conventions
    x_nchw = jax.random.normal(ks[0], (N, Cin, H, W), jnp.float32)
    w1 = jax.random.normal(ks[1], (Cout, Cin, 1, 1), jnp.float32) * 0.3
    b1 = jax.random.normal(ks[2], (Cout,), jnp.float32) * 0.1
    wk = jax.random.normal(ks[3], (DEPTH, Cout, Cout, 3, 3), jnp.float32) * 0.1
    bk = jax.random.normal(ks[4], (DEPTH, Cout), jnp.float32) * 0.1
    gamma = 1.0 + 0.1 * jax.random.normal(ks[5], (DEPTH, Cout), jnp.float32)
    beta = 0.1 * jax.random.normal(ks[6], (DEPTH, Cout), jnp.float32)

    kparams = prepare_params(w1, b1, wk, bk, gamma, beta, W)

    out_nchw = jax.block_until_ready(rrcnn_forward_nchw(x_nchw, kparams))
    assert out_nchw.shape == (N, Cout, H, W)

    # sanity check against float64 numpy reference (loose tol: MXU f32 precision)
    ref = ref_forward_nchw(x_nchw, w1, b1, wk, bk, gamma, beta)
    np.testing.assert_allclose(np.asarray(out_nchw), ref, rtol=5e-2, atol=5e-2)

    print("KERNEL_OK")
</pallas_src>

<mosaic_0001>
module attributes {stable_mosaic.version = 11 : i64} {
  func.func @_rrcnn_kernel(%arg0: memref<32x64xf32, #tpu.memory_space<vmem>>, %arg1: memref<64x128xf32, #tpu.memory_space<vmem>>, %arg2: memref<1x128xf32, #tpu.memory_space<vmem>>, %arg3: memref<2x3x128x128xf32, #tpu.memory_space<vmem>>, %arg4: memref<2x1x128xf32, #tpu.memory_space<vmem>>, %arg5: memref<2x1x128xf32, #tpu.memory_space<vmem>>, %arg6: memref<2x1x128xf32, #tpu.memory_space<vmem>>, %arg7: memref<128x128xf32, #tpu.memory_space<vmem>>, %arg8: memref<32x128xf32, #tpu.memory_space<vmem>>, %arg9: memref<2x18x128xf32, #tpu.memory_space<vmem>>) attributes {dimension_semantics = [], scalar_prefetch = 0 : i64, scratch_operands = 1 : i64, tpu.core_type = #tpu.core_type<tc>} {
    %cst = arith.constant 0.000000e+00 : f32
    %0 = vector.broadcast %cst : f32 to vector<2x18x128xf32>
    %c0 = arith.constant 0 : index
    %c0_0 = arith.constant 0 : index
    %c0_1 = arith.constant 0 : index
    %1 = vector.load %arg9[%c0, %c0_0, %c0_1] : memref<2x18x128xf32, #tpu.memory_space<vmem>>, vector<2x18x128xf32>
    tpu.vector_store %arg9[%c0, %c0_0, %c0_1], %0 {strides = array<i32>} : memref<2x18x128xf32, #tpu.memory_space<vmem>>, vector<2x18x128xf32>,
    %c0_2 = arith.constant 0 : index
    %c0_3 = arith.constant 0 : index
    %2 = vector.load %arg0[%c0_2, %c0_3] : memref<32x64xf32, #tpu.memory_space<vmem>>, vector<32x64xf32>
    %c0_4 = arith.constant 0 : index
    %c0_5 = arith.constant 0 : index
    %3 = vector.load %arg1[%c0_4, %c0_5] : memref<64x128xf32, #tpu.memory_space<vmem>>, vector<64x128xf32>
    %cst_6 = arith.constant dense<0.000000e+00> : vector<32x128xf32>
    %4 = tpu.matmul %2, %3, %cst_6 {dimension_numbers = #tpu.dot_dimension_numbers<[1], [0], [0], [1], [0, 0, 1, 1], [], []>} : vector<32x64xf32>, vector<64x128xf32>, vector<32x128xf32> -> vector<32x128xf32>
    %c0_7 = arith.constant 0 : index
    %c0_8 = arith.constant 0 : index
    %5 = vector.load %arg2[%c0_7, %c0_8] : memref<1x128xf32, #tpu.memory_space<vmem>>, vector<1x128xf32>
    %6 = vector.broadcast %5 : vector<1x128xf32> to vector<32x128xf32>
    %7 = arith.addf %4, %6 : vector<32x128xf32>
    %c0_9 = arith.constant 0 : index
    %c0_10 = arith.constant 0 : index
    %8 = vector.load %arg7[%c0_9, %c0_10] : memref<128x128xf32, #tpu.memory_space<vmem>>, vector<128x128xf32>
    %c0_11 = arith.constant 0 : index
    %c0_12 = arith.constant 0 : index
    %c0_13 = arith.constant 0 : index
    %c0_14 = arith.constant 0 : index
    %9 = vector.load %arg3[%c0_11, %c0_12, %c0_13, %c0_14] : memref<2x3x128x128xf32, #tpu.memory_space<vmem>>, vector<1x1x128x128xf32>
    %10 = vector.shape_cast %9 : vector<1x1x128x128xf32> to vector<128x128xf32>
    %c0_15 = arith.constant 0 : index
    %c1 = arith.constant 1 : index
    %c0_16 = arith.constant 0 : index
    %c0_17 = arith.constant 0 : index
    %11 = vector.load %arg3[%c0_15, %c1, %c0_16, %c0_17] : memref<2x3x128x128xf32, #tpu.memory_space<vmem>>, vector<1x1x128x128xf32>
    %12 = vector.shape_cast %11 : vector<1x1x128x128xf32> to vector<128x128xf32>
    %c0_18 = arith.constant 0 : index
    %c2 = arith.constant 2 : index
    %c0_19 = arith.constant 0 : index
    %c0_20 = arith.constant 0 : index
    %13 = vector.load %arg3[%c0_18, %c2, %c0_19, %c0_20] : memref<2x3x128x128xf32, #tpu.memory_space<vmem>>, vector<1x1x128x128xf32>
    %14 = vector.shape_cast %13 : vector<1x1x128x128xf32> to vector<128x128xf32>
    %c0_21 = arith.constant 0 : index
    %c0_22 = arith.constant 0 : index
    %c0_23 = arith.constant 0 : index
    %15 = vector.load %arg4[%c0_21, %c0_22, %c0_23] : memref<2x1x128xf32, #tpu.memory_space<vmem>>, vector<1x1x128xf32>
    %16 = vector.shape_cast %15 : vector<1x1x128xf32> to vector<1x128xf32>
    %c0_24 = arith.constant 0 : index
    %c0_25 = arith.constant 0 : index
    %c0_26 = arith.constant 0 : index
    %17 = vector.load %arg5[%c0_24, %c0_25, %c0_26] : memref<2x1x128xf32, #tpu.memory_space<vmem>>, vector<1x1x128xf32>
    %18 = vector.shape_cast %17 : vector<1x1x128xf32> to vector<1x128xf32>
    %c0_27 = arith.constant 0 : index
    %c0_28 = arith.constant 0 : index
    %c0_29 = arith.constant 0 : index
    %19 = vector.load %arg6[%c0_27, %c0_28, %c0_29] : memref<2x1x128xf32, #tpu.memory_space<vmem>>, vector<1x1x128xf32>
    %20 = vector.shape_cast %19 : vector<1x1x128xf32> to vector<1x128xf32>
    %21 = vector.shape_cast %7 : vector<32x128xf32> to vector<2x16x128xf32>
    %c0_30 = arith.constant 0 : index
    %c1_31 = arith.constant 1 : index
    %c0_32 = arith.constant 0 : index
    %22 = vector.load %arg9[%c0_30, %c1_31, %c0_32] : memref<2x18x128xf32, #tpu.memory_space<vmem>>, vector<2x16x128xf32>
    tpu.vector_store %arg9[%c0_30, %c1_31, %c0_32], %21 {strides = array<i32>} : memref<2x18x128xf32, #tpu.memory_space<vmem>>, vector<2x16x128xf32>,
    %c0_33 = arith.constant 0 : index
    %c0_34 = arith.constant 0 : index
    %c0_35 = arith.constant 0 : index
    %23 = vector.load %arg9[%c0_33, %c0_34, %c0_35] : memref<2x18x128xf32, #tpu.memory_space<vmem>>, vector<2x16x128xf32>
    %24 = vector.shape_cast %23 : vector<2x16x128xf32> to vector<32x128xf32>
    %c0_36 = arith.constant 0 : index
    %c2_37 = arith.constant 2 : index
    %c0_38 = arith.constant 0 : index
    %25 = vector.load %arg9[%c0_36, %c2_37, %c0_38] : memref<2x18x128xf32, #tpu.memory_space<vmem>>, vector<2x16x128xf32>
    %26 = vector.shape_cast %25 : vector<2x16x128xf32> to vector<32x128xf32>
    %cst_39 = arith.constant dense<0.000000e+00> : vector<32x128xf32>
    %27 = tpu.matmul %24, %10, %cst_39 {dimension_numbers = #tpu.dot_dimension_numbers<[1], [0], [0], [1], [0, 0, 1, 1], [], []>} : vector<32x128xf32>, vector<128x128xf32>, vector<32x128xf32> -> vector<32x128xf32>
    %cst_40 = arith.constant dense<0.000000e+00> : vector<32x128xf32>
    %28 = tpu.matmul %7, %12, %cst_40 {dimension_numbers = #tpu.dot_dimension_numbers<[1], [0], [0], [1], [0, 0, 1, 1], [], []>} : vector<32x128xf32>, vector<128x128xf32>, vector<32x128xf32> -> vector<32x128xf32>
    %29 = arith.addf %27, %28 : vector<32x128xf32>
    %cst_41 = arith.constant dense<0.000000e+00> : vector<32x128xf32>
    %30 = tpu.matmul %26, %14, %cst_41 {dimension_numbers = #tpu.dot_dimension_numbers<[1], [0], [0], [1], [0, 0, 1, 1], [], []>} : vector<32x128xf32>, vector<128x128xf32>, vector<32x128xf32> -> vector<32x128xf32>
    %31 = arith.addf %29, %30 : vector<32x128xf32>
    %32 = vector.broadcast %16 : vector<1x128xf32> to vector<32x128xf32>
    %33 = arith.addf %31, %32 : vector<32x128xf32>
    %cst_42 = arith.constant dense<0.000000e+00> : vector<128xf32>
    %34 = vector.multi_reduction <add>, %33, %cst_42 [0] : vector<32x128xf32> to vector<128xf32>
    %35 = vector.shape_cast %34 : vector<128xf32> to vector<1x128xf32>
    %36 = arith.mulf %33, %33 : vector<32x128xf32>
    %cst_43 = arith.constant dense<0.000000e+00> : vector<128xf32>
    %37 = vector.multi_reduction <add>, %36, %cst_43 [0] : vector<32x128xf32> to vector<128xf32>
    %38 = vector.shape_cast %37 : vector<128xf32> to vector<1x128xf32>
    %39 = tpu.concatenate %35, %38 in 0 : vector<1x128xf32>, vector<1x128xf32> -> vector<2x128xf32>
    %cst_44 = arith.constant dense<0.000000e+00> : vector<2x128xf32>
    %40 = tpu.matmul %39, %8, %cst_44 {dimension_numbers = #tpu.dot_dimension_numbers<[1], [0], [0], [1], [0, 0, 1, 1], [], []>} : vector<2x128xf32>, vector<128x128xf32>, vector<2x128xf32> -> vector<2x128xf32>
    %cst_45 = arith.constant 0.001953125 : f32
    %41 = vector.broadcast %cst_45 : f32 to vector<2x128xf32>
    %42 = arith.mulf %40, %41 : vector<2x128xf32>
    %43 = vector.extract_strided_slice %42 {offsets = [0, 0], sizes = [1, 128], strides = [1, 1]} : vector<2x128xf32> to vector<1x128xf32>
    %44 = vector.extract_strided_slice %42 {offsets = [1, 0], sizes = [1, 128], strides = [1, 1]} : vector<2x128xf32> to vector<1x128xf32>
    %45 = arith.mulf %43, %43 : vector<1x128xf32>
    %46 = arith.subf %44, %45 : vector<1x128xf32>
    %cst_46 = arith.constant 0.000000e+00 : f32
    %47 = vector.broadcast %cst_46 : f32 to vector<1x128xf32>
    %48 = arith.maximumf %46, %47 : vector<1x128xf32>
    %cst_47 = arith.constant 9.99999974E-6 : f32
    %49 = vector.broadcast %cst_47 : f32 to vector<1x128xf32>
    %50 = arith.addf %48, %49 : vector<1x128xf32>
    %51 = math.rsqrt %50 : vector<1x128xf32>
    %52 = arith.mulf %18, %51 : vector<1x128xf32>
    %53 = arith.mulf %43, %52 : vector<1x128xf32>
    %54 = arith.subf %20, %53 : vector<1x128xf32>
    %55 = vector.broadcast %52 : vector<1x128xf32> to vector<32x128xf32>
    %56 = arith.mulf %33, %55 : vector<32x128xf32>
    %57 = vector.broadcast %54 : vector<1x128xf32> to vector<32x128xf32>
    %58 = arith.addf %56, %57 : vector<32x128xf32>
    %cst_48 = arith.constant 0.000000e+00 : f32
    %59 = vector.broadcast %cst_48 : f32 to vector<32x128xf32>
    %60 = arith.maximumf %58, %59 : vector<32x128xf32>
    %61 = arith.addf %7, %60 : vector<32x128xf32>
    %62 = vector.shape_cast %61 : vector<32x128xf32> to vector<2x16x128xf32>
    %c0_49 = arith.constant 0 : index
    %c1_50 = arith.constant 1 : index
    %c0_51 = arith.constant 0 : index
    %63 = vector.load %arg9[%c0_49, %c1_50, %c0_51] : memref<2x18x128xf32, #tpu.memory_space<vmem>>, vector<2x16x128xf32>
    tpu.vector_store %arg9[%c0_49, %c1_50, %c0_51], %62 {strides = array<i32>} : memref<2x18x128xf32, #tpu.memory_space<vmem>>, vector<2x16x128xf32>,
    %c0_52 = arith.constant 0 : index
    %c0_53 = arith.constant 0 : index
    %c0_54 = arith.constant 0 : index
    %64 = vector.load %arg9[%c0_52, %c0_53, %c0_54] : memref<2x18x128xf32, #tpu.memory_space<vmem>>, vector<2x16x128xf32>
    %65 = vector.shape_cast %64 : vector<2x16x128xf32> to vector<32x128xf32>
    %c0_55 = arith.constant 0 : index
    %c2_56 = arith.constant 2 : index
    %c0_57 = arith.constant 0 : index
    %66 = vector.load %arg9[%c0_55, %c2_56, %c0_57] : memref<2x18x128xf32, #tpu.memory_space<vmem>>, vector<2x16x128xf32>
    %67 = vector.shape_cast %66 : vector<2x16x128xf32> to vector<32x128xf32>
    %cst_58 = arith.constant dense<0.000000e+00> : vector<32x128xf32>
    %68 = tpu.matmul %65, %10, %cst_58 {dimension_numbers = #tpu.dot_dimension_numbers<[1], [0], [0], [1], [0, 0, 1, 1], [], []>} : vector<32x128xf32>, vector<128x128xf32>, vector<32x128xf32> -> vector<32x128xf32>
    %cst_59 = arith.constant dense<0.000000e+00> : vector<32x128xf32>
    %69 = tpu.matmul %61, %12, %cst_59 {dimension_numbers = #tpu.dot_dimension_numbers<[1], [0], [0], [1], [0, 0, 1, 1], [], []>} : vector<32x128xf32>, vector<128x128xf32>, vector<32x128xf32> -> vector<32x128xf32>
    %70 = arith.addf %68, %69 : vector<32x128xf32>
    %cst_60 = arith.constant dense<0.000000e+00> : vector<32x128xf32>
    %71 = tpu.matmul %67, %14, %cst_60 {dimension_numbers = #tpu.dot_dimension_numbers<[1], [0], [0], [1], [0, 0, 1, 1], [], []>} : vector<32x128xf32>, vector<128x128xf32>, vector<32x128xf32> -> vector<32x128xf32>
    %72 = arith.addf %70, %71 : vector<32x128xf32>
    %73 = vector.broadcast %16 : vector<1x128xf32> to vector<32x128xf32>
    %74 = arith.addf %72, %73 : vector<32x128xf32>
    %cst_61 = arith.constant dense<0.000000e+00> : vector<128xf32>
    %75 = vector.multi_reduction <add>, %74, %cst_61 [0] : vector<32x128xf32> to vector<128xf32>
    %76 = vector.shape_cast %75 : vector<128xf32> to vector<1x128xf32>
    %77 = arith.mulf %74, %74 : vector<32x128xf32>
    %cst_62 = arith.constant dense<0.000000e+00> : vector<128xf32>
    %78 = vector.multi_reduction <add>, %77, %cst_62 [0] : vector<32x128xf32> to vector<128xf32>
    %79 = vector.shape_cast %78 : vector<128xf32> to vector<1x128xf32>
    %80 = tpu.concatenate %76, %79 in 0 : vector<1x128xf32>, vector<1x128xf32> -> vector<2x128xf32>
    %cst_63 = arith.constant dense<0.000000e+00> : vector<2x128xf32>
    %81 = tpu.matmul %80, %8, %cst_63 {dimension_numbers = #tpu.dot_dimension_numbers<[1], [0], [0], [1], [0, 0, 1, 1], [], []>} : vector<2x128xf32>, vector<128x128xf32>, vector<2x128xf32> -> vector<2x128xf32>
    %cst_64 = arith.constant 0.001953125 : f32
    %82 = vector.broadcast %cst_64 : f32 to vector<2x128xf32>
    %83 = arith.mulf %81, %82 : vector<2x128xf32>
    %84 = vector.extract_strided_slice %83 {offsets = [0, 0], sizes = [1, 128], strides = [1, 1]} : vector<2x128xf32> to vector<1x128xf32>
    %85 = vector.extract_strided_slice %83 {offsets = [1, 0], sizes = [1, 128], strides = [1, 1]} : vector<2x128xf32> to vector<1x128xf32>
    %86 = arith.mulf %84, %84 : vector<1x128xf32>
    %87 = arith.subf %85, %86 : vector<1x128xf32>
    %cst_65 = arith.constant 0.000000e+00 : f32
    %88 = vector.broadcast %cst_65 : f32 to vector<1x128xf32>
    %89 = arith.maximumf %87, %88 : vector<1x128xf32>
    %cst_66 = arith.constant 9.99999974E-6 : f32
    %90 = vector.broadcast %cst_66 : f32 to vector<1x128xf32>
    %91 = arith.addf %89, %90 : vector<1x128xf32>
    %92 = math.rsqrt %91 : vector<1x128xf32>
    %93 = arith.mulf %18, %92 : vector<1x128xf32>
    %94 = arith.mulf %84, %93 : vector<1x128xf32>
    %95 = arith.subf %20, %94 : vector<1x128xf32>
    %96 = vector.broadcast %93 : vector<1x128xf32> to vector<32x128xf32>
    %97 = arith.mulf %74, %96 : vector<32x128xf32>
    %98 = vector.broadcast %95 : vector<1x128xf32> to vector<32x128xf32>
    %99 = arith.addf %97, %98 : vector<32x128xf32>
    %cst_67 = arith.constant 0.000000e+00 : f32
    %100 = vector.broadcast %cst_67 : f32 to vector<32x128xf32>
    %101 = arith.maximumf %99, %100 : vector<32x128xf32>
    %102 = arith.addf %7, %101 : vector<32x128xf32>
    %103 = vector.shape_cast %102 : vector<32x128xf32> to vector<2x16x128xf32>
    %c0_68 = arith.constant 0 : index
    %c1_69 = arith.constant 1 : index
    %c0_70 = arith.constant 0 : index
    %104 = vector.load %arg9[%c0_68, %c1_69, %c0_70] : memref<2x18x128xf32, #tpu.memory_space<vmem>>, vector<2x16x128xf32>
    tpu.vector_store %arg9[%c0_68, %c1_69, %c0_70], %103 {strides = array<i32>} : memref<2x18x128xf32, #tpu.memory_space<vmem>>, vector<2x16x128xf32>,
    %c0_71 = arith.constant 0 : index
    %c0_72 = arith.constant 0 : index
    %c0_73 = arith.constant 0 : index
    %105 = vector.load %arg9[%c0_71, %c0_72, %c0_73] : memref<2x18x128xf32, #tpu.memory_space<vmem>>, vector<2x16x128xf32>
    %106 = vector.shape_cast %105 : vector<2x16x128xf32> to vector<32x128xf32>
    %c0_74 = arith.constant 0 : index
    %c2_75 = arith.constant 2 : index
    %c0_76 = arith.constant 0 : index
    %107 = vector.load %arg9[%c0_74, %c2_75, %c0_76] : memref<2x18x128xf32, #tpu.memory_space<vmem>>, vector<2x16x128xf32>
    %108 = vector.shape_cast %107 : vector<2x16x128xf32> to vector<32x128xf32>
    %cst_77 = arith.constant dense<0.000000e+00> : vector<32x128xf32>
    %109 = tpu.matmul %106, %10, %cst_77 {dimension_numbers = #tpu.dot_dimension_numbers<[1], [0], [0], [1], [0, 0, 1, 1], [], []>} : vector<32x128xf32>, vector<128x128xf32>, vector<32x128xf32> -> vector<32x128xf32>
    %cst_78 = arith.constant dense<0.000000e+00> : vector<32x128xf32>
    %110 = tpu.matmul %102, %12, %cst_78 {dimension_numbers = #tpu.dot_dimension_numbers<[1], [0], [0], [1], [0, 0, 1, 1], [], []>} : vector<32x128xf32>, vector<128x128xf32>, vector<32x128xf32> -> vector<32x128xf32>
    %111 = arith.addf %109, %110 : vector<32x128xf32>
    %cst_79 = arith.constant dense<0.000000e+00> : vector<32x128xf32>
    %112 = tpu.matmul %108, %14, %cst_79 {dimension_numbers = #tpu.dot_dimension_numbers<[1], [0], [0], [1], [0, 0, 1, 1], [], []>} : vector<32x128xf32>, vector<128x128xf32>, vector<32x128xf32> -> vector<32x128xf32>
    %113 = arith.addf %111, %112 : vector<32x128xf32>
    %114 = vector.broadcast %16 : vector<1x128xf32> to vector<32x128xf32>
    %115 = arith.addf %113, %114 : vector<32x128xf32>
    %cst_80 = arith.constant dense<0.000000e+00> : vector<128xf32>
    %116 = vector.multi_reduction <add>, %115, %cst_80 [0] : vector<32x128xf32> to vector<128xf32>
    %117 = vector.shape_cast %116 : vector<128xf32> to vector<1x128xf32>
    %118 = arith.mulf %115, %115 : vector<32x128xf32>
    %cst_81 = arith.constant dense<0.000000e+00> : vector<128xf32>
    %119 = vector.multi_reduction <add>, %118, %cst_81 [0] : vector<32x128xf32> to vector<128xf32>
    %120 = vector.shape_cast %119 : vector<128xf32> to vector<1x128xf32>
    %121 = tpu.concatenate %117, %120 in 0 : vector<1x128xf32>, vector<1x128xf32> -> vector<2x128xf32>
    %cst_82 = arith.constant dense<0.000000e+00> : vector<2x128xf32>
    %122 = tpu.matmul %121, %8, %cst_82 {dimension_numbers = #tpu.dot_dimension_numbers<[1], [0], [0], [1], [0, 0, 1, 1], [], []>} : vector<2x128xf32>, vector<128x128xf32>, vector<2x128xf32> -> vector<2x128xf32>
    %cst_83 = arith.constant 0.001953125 : f32
    %123 = vector.broadcast %cst_83 : f32 to vector<2x128xf32>
    %124 = arith.mulf %122, %123 : vector<2x128xf32>
    %125 = vector.extract_strided_slice %124 {offsets = [0, 0], sizes = [1, 128], strides = [1, 1]} : vector<2x128xf32> to vector<1x128xf32>
    %126 = vector.extract_strided_slice %124 {offsets = [1, 0], sizes = [1, 128], strides = [1, 1]} : vector<2x128xf32> to vector<1x128xf32>
    %127 = arith.mulf %125, %125 : vector<1x128xf32>
    %128 = arith.subf %126, %127 : vector<1x128xf32>
    %cst_84 = arith.constant 0.000000e+00 : f32
    %129 = vector.broadcast %cst_84 : f32 to vector<1x128xf32>
    %130 = arith.maximumf %128, %129 : vector<1x128xf32>
    %cst_85 = arith.constant 9.99999974E-6 : f32
    %131 = vector.broadcast %cst_85 : f32 to vector<1x128xf32>
    %132 = arith.addf %130, %131 : vector<1x128xf32>
    %133 = math.rsqrt %132 : vector<1x128xf32>
    %134 = arith.mulf %18, %133 : vector<1x128xf32>
    %135 = arith.mulf %125, %134 : vector<1x128xf32>
    %136 = arith.subf %20, %135 : vector<1x128xf32>
    %137 = vector.broadcast %134 : vector<1x128xf32> to vector<32x128xf32>
    %138 = arith.mulf %115, %137 : vector<32x128xf32>
    %139 = vector.broadcast %136 : vector<1x128xf32> to vector<32x128xf32>
    %140 = arith.addf %138, %139 : vector<32x128xf32>
    %cst_86 = arith.constant 0.000000e+00 : f32
    %141 = vector.broadcast %cst_86 : f32 to vector<32x128xf32>
    %142 = arith.maximumf %140, %141 : vector<32x128xf32>
    %c1_87 = arith.constant 1 : index
    %c0_88 = arith.constant 0 : index
    %c0_89 = arith.constant 0 : index
    %c0_90 = arith.constant 0 : index
    %143 = vector.load %arg3[%c1_87, %c0_88, %c0_89, %c0_90] : memref<2x3x128x128xf32, #tpu.memory_space<vmem>>, vector<1x1x128x128xf32>
    %144 = vector.shape_cast %143 : vector<1x1x128x128xf32> to vector<128x128xf32>
    %c1_91 = arith.constant 1 : index
    %c1_92 = arith.constant 1 : index
    %c0_93 = arith.constant 0 : index
    %c0_94 = arith.constant 0 : index
    %145 = vector.load %arg3[%c1_91, %c1_92, %c0_93, %c0_94] : memref<2x3x128x128xf32, #tpu.memory_space<vmem>>, vector<1x1x128x128xf32>
    %146 = vector.shape_cast %145 : vector<1x1x128x128xf32> to vector<128x128xf32>
    %c1_95 = arith.constant 1 : index
    %c2_96 = arith.constant 2 : index
    %c0_97 = arith.constant 0 : index
    %c0_98 = arith.constant 0 : index
    %147 = vector.load %arg3[%c1_95, %c2_96, %c0_97, %c0_98] : memref<2x3x128x128xf32, #tpu.memory_space<vmem>>, vector<1x1x128x128xf32>
    %148 = vector.shape_cast %147 : vector<1x1x128x128xf32> to vector<128x128xf32>
    %c1_99 = arith.constant 1 : index
    %c0_100 = arith.constant 0 : index
    %c0_101 = arith.constant 0 : index
    %149 = vector.load %arg4[%c1_99, %c0_100, %c0_101] : memref<2x1x128xf32, #tpu.memory_space<vmem>>, vector<1x1x128xf32>
    %150 = vector.shape_cast %149 : vector<1x1x128xf32> to vector<1x128xf32>
    %c1_102 = arith.constant 1 : index
    %c0_103 = arith.constant 0 : index
    %c0_104 = arith.constant 0 : index
    %151 = vector.load %arg5[%c1_102, %c0_103, %c0_104] : memref<2x1x128xf32, #tpu.memory_space<vmem>>, vector<1x1x128xf32>
    %152 = vector.shape_cast %151 : vector<1x1x128xf32> to vector<1x128xf32>
    %c1_105 = arith.constant 1 : index
    %c0_106 = arith.constant 0 : index
    %c0_107 = arith.constant 0 : index
    %153 = vector.load %arg6[%c1_105, %c0_106, %c0_107] : memref<2x1x128xf32, #tpu.memory_space<vmem>>, vector<1x1x128xf32>
    %154 = vector.shape_cast %153 : vector<1x1x128xf32> to vector<1x128xf32>
    %155 = vector.shape_cast %142 : vector<32x128xf32> to vector<2x16x128xf32>
    %c0_108 = arith.constant 0 : index
    %c1_109 = arith.constant 1 : index
    %c0_110 = arith.constant 0 : index
    %156 = vector.load %arg9[%c0_108, %c1_109, %c0_110] : memref<2x18x128xf32, #tpu.memory_space<vmem>>, vector<2x16x128xf32>
    tpu.vector_store %arg9[%c0_108, %c1_109, %c0_110], %155 {strides = array<i32>} : memref<2x18x128xf32, #tpu.memory_space<vmem>>, vector<2x16x128xf32>,
    %c0_111 = arith.constant 0 : index
    %c0_112 = arith.constant 0 : index
    %c0_113 = arith.constant 0 : index
    %157 = vector.load %arg9[%c0_111, %c0_112, %c0_113] : memref<2x18x128xf32, #tpu.memory_space<vmem>>, vector<2x16x128xf32>
    %158 = vector.shape_cast %157 : vector<2x16x128xf32> to vector<32x128xf32>
    %c0_114 = arith.constant 0 : index
    %c2_115 = arith.constant 2 : index
    %c0_116 = arith.constant 0 : index
    %159 = vector.load %arg9[%c0_114, %c2_115, %c0_116] : memref<2x18x128xf32, #tpu.memory_space<vmem>>, vector<2x16x128xf32>
    %160 = vector.shape_cast %159 : vector<2x16x128xf32> to vector<32x128xf32>
    %cst_117 = arith.constant dense<0.000000e+00> : vector<32x128xf32>
    %161 = tpu.matmul %158, %144, %cst_117 {dimension_numbers = #tpu.dot_dimension_numbers<[1], [0], [0], [1], [0, 0, 1, 1], [], []>} : vector<32x128xf32>, vector<128x128xf32>, vector<32x128xf32> -> vector<32x128xf32>
    %cst_118 = arith.constant dense<0.000000e+00> : vector<32x128xf32>
    %162 = tpu.matmul %142, %146, %cst_118 {dimension_numbers = #tpu.dot_dimension_numbers<[1], [0], [0], [1], [0, 0, 1, 1], [], []>} : vector<32x128xf32>, vector<128x128xf32>, vector<32x128xf32> -> vector<32x128xf32>
    %163 = arith.addf %161, %162 : vector<32x128xf32>
    %cst_119 = arith.constant dense<0.000000e+00> : vector<32x128xf32>
    %164 = tpu.matmul %160, %148, %cst_119 {dimension_numbers = #tpu.dot_dimension_numbers<[1], [0], [0], [1], [0, 0, 1, 1], [], []>} : vector<32x128xf32>, vector<128x128xf32>, vector<32x128xf32> -> vector<32x128xf32>
    %165 = arith.addf %163, %164 : vector<32x128xf32>
    %166 = vector.broadcast %150 : vector<1x128xf32> to vector<32x128xf32>
    %167 = arith.addf %165, %166 : vector<32x128xf32>
    %cst_120 = arith.constant dense<0.000000e+00> : vector<128xf32>
    %168 = vector.multi_reduction <add>, %167, %cst_120 [0] : vector<32x128xf32> to vector<128xf32>
    %169 = vector.shape_cast %168 : vector<128xf32> to vector<1x128xf32>
    %170 = arith.mulf %167, %167 : vector<32x128xf32>
    %cst_121 = arith.constant dense<0.000000e+00> : vector<128xf32>
    %171 = vector.multi_reduction <add>, %170, %cst_121 [0] : vector<32x128xf32> to vector<128xf32>
    %172 = vector.shape_cast %171 : vector<128xf32> to vector<1x128xf32>
    %173 = tpu.concatenate %169, %172 in 0 : vector<1x128xf32>, vector<1x128xf32> -> vector<2x128xf32>
    %cst_122 = arith.constant dense<0.000000e+00> : vector<2x128xf32>
    %174 = tpu.matmul %173, %8, %cst_122 {dimension_numbers = #tpu.dot_dimension_numbers<[1], [0], [0], [1], [0, 0, 1, 1], [], []>} : vector<2x128xf32>, vector<128x128xf32>, vector<2x128xf32> -> vector<2x128xf32>
    %cst_123 = arith.constant 0.001953125 : f32
    %175 = vector.broadcast %cst_123 : f32 to vector<2x128xf32>
    %176 = arith.mulf %174, %175 : vector<2x128xf32>
    %177 = vector.extract_strided_slice %176 {offsets = [0, 0], sizes = [1, 128], strides = [1, 1]} : vector<2x128xf32> to vector<1x128xf32>
    %178 = vector.extract_strided_slice %176 {offsets = [1, 0], sizes = [1, 128], strides = [1, 1]} : vector<2x128xf32> to vector<1x128xf32>
    %179 = arith.mulf %177, %177 : vector<1x128xf32>
    %180 = arith.subf %178, %179 : vector<1x128xf32>
    %cst_124 = arith.constant 0.000000e+00 : f32
    %181 = vector.broadcast %cst_124 : f32 to vector<1x128xf32>
    %182 = arith.maximumf %180, %181 : vector<1x128xf32>
    %cst_125 = arith.constant 9.99999974E-6 : f32
    %183 = vector.broadcast %cst_125 : f32 to vector<1x128xf32>
    %184 = arith.addf %182, %183 : vector<1x128xf32>
    %185 = math.rsqrt %184 : vector<1x128xf32>
    %186 = arith.mulf %152, %185 : vector<1x128xf32>
    %187 = arith.mulf %177, %186 : vector<1x128xf32>
    %188 = arith.subf %154, %187 : vector<1x128xf32>
    %189 = vector.broadcast %186 : vector<1x128xf32> to vector<32x128xf32>
    %190 = arith.mulf %167, %189 : vector<32x128xf32>
    %191 = vector.broadcast %188 : vector<1x128xf32> to vector<32x128xf32>
    %192 = arith.addf %190, %191 : vector<32x128xf32>
    %cst_126 = arith.constant 0.000000e+00 : f32
    %193 = vector.broadcast %cst_126 : f32 to vector<32x128xf32>
    %194 = arith.maximumf %192, %193 : vector<32x128xf32>
    %195 = arith.addf %142, %194 : vector<32x128xf32>
    %196 = vector.shape_cast %195 : vector<32x128xf32> to vector<2x16x128xf32>
    %c0_127 = arith.constant 0 : index
    %c1_128 = arith.constant 1 : index
    %c0_129 = arith.constant 0 : index
    %197 = vector.load %arg9[%c0_127, %c1_128, %c0_129] : memref<2x18x128xf32, #tpu.memory_space<vmem>>, vector<2x16x128xf32>
    tpu.vector_store %arg9[%c0_127, %c1_128, %c0_129], %196 {strides = array<i32>} : memref<2x18x128xf32, #tpu.memory_space<vmem>>, vector<2x16x128xf32>,
    %c0_130 = arith.constant 0 : index
    %c0_131 = arith.constant 0 : index
    %c0_132 = arith.constant 0 : index
    %198 = vector.load %arg9[%c0_130, %c0_131, %c0_132] : memref<2x18x128xf32, #tpu.memory_space<vmem>>, vector<2x16x128xf32>
    %199 = vector.shape_cast %198 : vector<2x16x128xf32> to vector<32x128xf32>
    %c0_133 = arith.constant 0 : index
    %c2_134 = arith.constant 2 : index
    %c0_135 = arith.constant 0 : index
    %200 = vector.load %arg9[%c0_133, %c2_134, %c0_135] : memref<2x18x128xf32, #tpu.memory_space<vmem>>, vector<2x16x128xf32>
    %201 = vector.shape_cast %200 : vector<2x16x128xf32> to vector<32x128xf32>
    %cst_136 = arith.constant dense<0.000000e+00> : vector<32x128xf32>
    %202 = tpu.matmul %199, %144, %cst_136 {dimension_numbers = #tpu.dot_dimension_numbers<[1], [0], [0], [1], [0, 0, 1, 1], [], []>} : vector<32x128xf32>, vector<128x128xf32>, vector<32x128xf32> -> vector<32x128xf32>
    %cst_137 = arith.constant dense<0.000000e+00> : vector<32x128xf32>
    %203 = tpu.matmul %195, %146, %cst_137 {dimension_numbers = #tpu.dot_dimension_numbers<[1], [0], [0], [1], [0, 0, 1, 1], [], []>} : vector<32x128xf32>, vector<128x128xf32>, vector<32x128xf32> -> vector<32x128xf32>
    %204 = arith.addf %202, %203 : vector<32x128xf32>
    %cst_138 = arith.constant dense<0.000000e+00> : vector<32x128xf32>
    %205 = tpu.matmul %201, %148, %cst_138 {dimension_numbers = #tpu.dot_dimension_numbers<[1], [0], [0], [1], [0, 0, 1, 1], [], []>} : vector<32x128xf32>, vector<128x128xf32>, vector<32x128xf32> -> vector<32x128xf32>
    %206 = arith.addf %204, %205 : vector<32x128xf32>
    %207 = vector.broadcast %150 : vector<1x128xf32> to vector<32x128xf32>
    %208 = arith.addf %206, %207 : vector<32x128xf32>
    %cst_139 = arith.constant dense<0.000000e+00> : vector<128xf32>
    %209 = vector.multi_reduction <add>, %208, %cst_139 [0] : vector<32x128xf32> to vector<128xf32>
    %210 = vector.shape_cast %209 : vector<128xf32> to vector<1x128xf32>
    %211 = arith.mulf %208, %208 : vector<32x128xf32>
    %cst_140 = arith.constant dense<0.000000e+00> : vector<128xf32>
    %212 = vector.multi_reduction <add>, %211, %cst_140 [0] : vector<32x128xf32> to vector<128xf32>
    %213 = vector.shape_cast %212 : vector<128xf32> to vector<1x128xf32>
    %214 = tpu.concatenate %210, %213 in 0 : vector<1x128xf32>, vector<1x128xf32> -> vector<2x128xf32>
    %cst_141 = arith.constant dense<0.000000e+00> : vector<2x128xf32>
    %215 = tpu.matmul %214, %8, %cst_141 {dimension_numbers = #tpu.dot_dimension_numbers<[1], [0], [0], [1], [0, 0, 1, 1], [], []>} : vector<2x128xf32>, vector<128x128xf32>, vector<2x128xf32> -> vector<2x128xf32>
    %cst_142 = arith.constant 0.001953125 : f32
    %216 = vector.broadcast %cst_142 : f32 to vector<2x128xf32>
    %217 = arith.mulf %215, %216 : vector<2x128xf32>
    %218 = vector.extract_strided_slice %217 {offsets = [0, 0], sizes = [1, 128], strides = [1, 1]} : vector<2x128xf32> to vector<1x128xf32>
    %219 = vector.extract_strided_slice %217 {offsets = [1, 0], sizes = [1, 128], strides = [1, 1]} : vector<2x128xf32> to vector<1x128xf32>
    %220 = arith.mulf %218, %218 : vector<1x128xf32>
    %221 = arith.subf %219, %220 : vector<1x128xf32>
    %cst_143 = arith.constant 0.000000e+00 : f32
    %222 = vector.broadcast %cst_143 : f32 to vector<1x128xf32>
    %223 = arith.maximumf %221, %222 : vector<1x128xf32>
    %cst_144 = arith.constant 9.99999974E-6 : f32
    %224 = vector.broadcast %cst_144 : f32 to vector<1x128xf32>
    %225 = arith.addf %223, %224 : vector<1x128xf32>
    %226 = math.rsqrt %225 : vector<1x128xf32>
    %227 = arith.mulf %152, %226 : vector<1x128xf32>
    %228 = arith.mulf %218, %227 : vector<1x128xf32>
    %229 = arith.subf %154, %228 : vector<1x128xf32>
    %230 = vector.broadcast %227 : vector<1x128xf32> to vector<32x128xf32>
    %231 = arith.mulf %208, %230 : vector<32x128xf32>
    %232 = vector.broadcast %229 : vector<1x128xf32> to vector<32x128xf32>
    %233 = arith.addf %231, %232 : vector<32x128xf32>
    %cst_145 = arith.constant 0.000000e+00 : f32
    %234 = vector.broadcast %cst_145 : f32 to vector<32x128xf32>
    %235 = arith.maximumf %233, %234 : vector<32x128xf32>
    %236 = arith.addf %142, %235 : vector<32x128xf32>
    %237 = vector.shape_cast %236 : vector<32x128xf32> to vector<2x16x128xf32>
    %c0_146 = arith.constant 0 : index
    %c1_147 = arith.constant 1 : index
    %c0_148 = arith.constant 0 : index
    %238 = vector.load %arg9[%c0_146, %c1_147, %c0_148] : memref<2x18x128xf32, #tpu.memory_space<vmem>>, vector<2x16x128xf32>
    tpu.vector_store %arg9[%c0_146, %c1_147, %c0_148], %237 {strides = array<i32>} : memref<2x18x128xf32, #tpu.memory_space<vmem>>, vector<2x16x128xf32>,
    %c0_149 = arith.constant 0 : index
    %c0_150 = arith.constant 0 : index
    %c0_151 = arith.constant 0 : index
    %239 = vector.load %arg9[%c0_149, %c0_150, %c0_151] : memref<2x18x128xf32, #tpu.memory_space<vmem>>, vector<2x16x128xf32>
    %240 = vector.shape_cast %239 : vector<2x16x128xf32> to vector<32x128xf32>
    %c0_152 = arith.constant 0 : index
    %c2_153 = arith.constant 2 : index
    %c0_154 = arith.constant 0 : index
    %241 = vector.load %arg9[%c0_152, %c2_153, %c0_154] : memref<2x18x128xf32, #tpu.memory_space<vmem>>, vector<2x16x128xf32>
    %242 = vector.shape_cast %241 : vector<2x16x128xf32> to vector<32x128xf32>
    %cst_155 = arith.constant dense<0.000000e+00> : vector<32x128xf32>
    %243 = tpu.matmul %240, %144, %cst_155 {dimension_numbers = #tpu.dot_dimension_numbers<[1], [0], [0], [1], [0, 0, 1, 1], [], []>} : vector<32x128xf32>, vector<128x128xf32>, vector<32x128xf32> -> vector<32x128xf32>
    %cst_156 = arith.constant dense<0.000000e+00> : vector<32x128xf32>
    %244 = tpu.matmul %236, %146, %cst_156 {dimension_numbers = #tpu.dot_dimension_numbers<[1], [0], [0], [1], [0, 0, 1, 1], [], []>} : vector<32x128xf32>, vector<128x128xf32>, vector<32x128xf32> -> vector<32x128xf32>
    %245 = arith.addf %243, %244 : vector<32x128xf32>
    %cst_157 = arith.constant dense<0.000000e+00> : vector<32x128xf32>
    %246 = tpu.matmul %242, %148, %cst_157 {dimension_numbers = #tpu.dot_dimension_numbers<[1], [0], [0], [1], [0, 0, 1, 1], [], []>} : vector<32x128xf32>, vector<128x128xf32>, vector<32x128xf32> -> vector<32x128xf32>
    %247 = arith.addf %245, %246 : vector<32x128xf32>
    %248 = vector.broadcast %150 : vector<1x128xf32> to vector<32x128xf32>
    %249 = arith.addf %247, %248 : vector<32x128xf32>
    %cst_158 = arith.constant dense<0.000000e+00> : vector<128xf32>
    %250 = vector.multi_reduction <add>, %249, %cst_158 [0] : vector<32x128xf32> to vector<128xf32>
    %251 = vector.shape_cast %250 : vector<128xf32> to vector<1x128xf32>
    %252 = arith.mulf %249, %249 : vector<32x128xf32>
    %cst_159 = arith.constant dense<0.000000e+00> : vector<128xf32>
    %253 = vector.multi_reduction <add>, %252, %cst_159 [0] : vector<32x128xf32> to vector<128xf32>
    %254 = vector.shape_cast %253 : vector<128xf32> to vector<1x128xf32>
    %255 = tpu.concatenate %251, %254 in 0 : vector<1x128xf32>, vector<1x128xf32> -> vector<2x128xf32>
    %cst_160 = arith.constant dense<0.000000e+00> : vector<2x128xf32>
    %256 = tpu.matmul %255, %8, %cst_160 {dimension_numbers = #tpu.dot_dimension_numbers<[1], [0], [0], [1], [0, 0, 1, 1], [], []>} : vector<2x128xf32>, vector<128x128xf32>, vector<2x128xf32> -> vector<2x128xf32>
    %cst_161 = arith.constant 0.001953125 : f32
    %257 = vector.broadcast %cst_161 : f32 to vector<2x128xf32>
    %258 = arith.mulf %256, %257 : vector<2x128xf32>
    %259 = vector.extract_strided_slice %258 {offsets = [0, 0], sizes = [1, 128], strides = [1, 1]} : vector<2x128xf32> to vector<1x128xf32>
    %260 = vector.extract_strided_slice %258 {offsets = [1, 0], sizes = [1, 128], strides = [1, 1]} : vector<2x128xf32> to vector<1x128xf32>
    %261 = arith.mulf %259, %259 : vector<1x128xf32>
    %262 = arith.subf %260, %261 : vector<1x128xf32>
    %cst_162 = arith.constant 0.000000e+00 : f32
    %263 = vector.broadcast %cst_162 : f32 to vector<1x128xf32>
    %264 = arith.maximumf %262, %263 : vector<1x128xf32>
    %cst_163 = arith.constant 9.99999974E-6 : f32
    %265 = vector.broadcast %cst_163 : f32 to vector<1x128xf32>
    %266 = arith.addf %264, %265 : vector<1x128xf32>
    %267 = math.rsqrt %266 : vector<1x128xf32>
    %268 = arith.mulf %152, %267 : vector<1x128xf32>
    %269 = arith.mulf %259, %268 : vector<1x128xf32>
    %270 = arith.subf %154, %269 : vector<1x128xf32>
    %271 = vector.broadcast %268 : vector<1x128xf32> to vector<32x128xf32>
    %272 = arith.mulf %249, %271 : vector<32x128xf32>
    %273 = vector.broadcast %270 : vector<1x128xf32> to vector<32x128xf32>
    %274 = arith.addf %272, %273 : vector<32x128xf32>
    %cst_164 = arith.constant 0.000000e+00 : f32
    %275 = vector.broadcast %cst_164 : f32 to vector<32x128xf32>
    %276 = arith.maximumf %274, %275 : vector<32x128xf32>
    %c0_165 = arith.constant 0 : index
    %c0_166 = arith.constant 0 : index
    %277 = vector.load %arg8[%c0_165, %c0_166] : memref<32x128xf32, #tpu.memory_space<vmem>>, vector<32x128xf32>
    tpu.vector_store %arg8[%c0_165, %c0_166], %276 {strides = array<i32>} : memref<32x128xf32, #tpu.memory_space<vmem>>, vector<32x128xf32>,
    return
  }
}

</mosaic_0001>

<bundles_post_ra>
// kernel: rrcnn_forward_nchw.1
= control target key start
LH: loop header
LB: loop body
LE: loop exit
PB: predicated region body
PF: predicated region fallthrough
CT: control target
= control target key end

     0   :  { %13 = vsyncpa [#allocation4], 0  ;;  %s1499_s30 = smov [#allocation3]   ;;  %s1500_s10 = smov 128   ;;  %s2516_s0 = inlined_call_operand.vmem [shape: f32[32,64], index: 0, kind: input, shape index: {}]   ;;  %s2517_s1 = inlined_call_operand.vmem [shape: f32[64,128], index: 1, kind: input, shape index: {}]   ;;  %s2518_s2 = inlined_call_operand.vmem [shape: f32[1,128], index: 2, kind: input, shape index: {}]   ;;  %s2519_s3 = inlined_call_operand.hbm [shape: f32[2,3,128,128], index: 3, kind: input, shape index: {}]   ;;  %s2520_s4 = inlined_call_operand.vmem [shape: f32[2,1,128], index: 4, kind: input, shape index: {}]   ;;  %s2521_s5 = inlined_call_operand.vmem [shape: f32[2,1,128], index: 5, kind: input, shape index: {}]   ;;  %s2522_s6 = inlined_call_operand.vmem [shape: f32[2,1,128], index: 6, kind: input, shape index: {}]   ;;  %s2523_s7 = inlined_call_operand.vmem [shape: f32[128,128], index: 7, kind: input, shape index: {}]   ;;  %s2524_s8 = inlined_call_operand.vmem [shape: f32[32,128], index: 8, kind: output, shape index: {}]  }
   0x1   :  { %s24_s29 = sshll.u32 %s2519_s3, 4  ;;  %s26_s9 = sshll.u32 %s1499_s30, 4  ;;  %s25_s29 = int_to_ptr.hbm [resolvable:$true] %s24_s29  ;;  %s27_s9 = int_to_ptr.vmem [resolvable:$true] %s26_s9 }
   0x2   :  { %s1501_s11 = smov 8  }
   0x3   :  { %32 = dma.hbm_to_vmem [thread:$0]  %s25_s29, 12288, %s27_s9, [#allocation4], %s1500_s10, %s1500_s10, %s1501_s11  }
   0x4   :  { %1497 = dma.done.wait [#allocation4], 12288  }
   0x5   :  { %1498 = vsyncadd [#allocation4], 4294955008  ;;  %v62_v0 = vld [vmem:[%s2517_s1 + $0x38] sm:$0xff]  ;;  %v61_v1 = vld [vmem:[%s2517_s1 + $0x30] sm:$0xff]  ;;  %v1502_v9 = vmov 0.0   ;;  %vm67_vm0 = vcmask 523264  }
   0x6   :  { %88 = vmatpush.msra.mxu0 %v62_v0  ;;  %v60_v2 = vld [vmem:[%s2517_s1 + $0x28] sm:$0xff]  ;;  %v59_v3 = vld [vmem:[%s2517_s1 + $0x20] sm:$0xff]  ;;  %v58_v4 = vld [vmem:[%s2517_s1 + $0x18] sm:$0xff]  ;;  %45 = vst [vmem:[#allocation2] sm:$0xff] %v1502_v9  ;;  %vm310_vm1 = vcmask 1040384  }
   0x7   :  { %v57_v5 = vld [vmem:[%s2517_s1 + $0x10] sm:$0xff]  ;;  %v1571_v7 = vld [vmem:[#allocation3 + $0xf0] sm:$0xff]  ;;  %v1579_v11 = vld [vmem:[#allocation3 + $0xe8] sm:$0xff]  ;;  %46 = vst [vmem:[#allocation2 + $0x8] sm:$0xff] %v1502_v9 }
   0x8   :  { %89 = vmatpush.msra.mxu0 %v61_v1  ;;  %v1569_v6 = vld [vmem:[#allocation3 + $0xf8] sm:$0xff]  ;;  %v56_v10 = vld [vmem:[%s2517_s1 + $0x8] sm:$0xff]  ;;  %v1585_v13 = vld [vmem:[#allocation3 + $0x68] sm:$0xff]  ;;  %47 = vst [vmem:[#allocation2 + $0x10] sm:$0x3] %v1502_v9 }
   0x9   :  { %190 = vmatpush.msra.mxu1 %v1569_v6  ;;  %v1574_v8 = vld [vmem:[#allocation3 + $0x78] sm:$0xff]  ;;  %v1582_v12 = vld [vmem:[#allocation3 + $0x70] sm:$0xff]  ;;  %v55_v14 = vld [vmem:[%s2517_s1] sm:$0xff]  ;;  %48 = vst [vmem:[#allocation2 + $0x18] sm:$0xff] %v1502_v9 }
   0xa   :  { %90 = vmatpush.msra.mxu0 %v60_v2  ;;  %219 = vmatpush.msra.mxu2 %v1574_v8  ;;  %v1590_v15 = vld [vmem:[#allocation3 + $0xe0] sm:$0xff]  ;;  %v1593_v16 = vld [vmem:[#allocation3 + $0x178] sm:$0xff]  ;;  %v51_v17 = vld [vmem:[%s2516_s0] sm:$0xff]  ;;  %49 = vst [vmem:[#allocation2 + $0x20] sm:$0xff] %v1502_v9 }
   0xb   :  { %191 = vmatpush.msra.mxu1 %v1571_v7  ;;  %v1599_v18 = vld [vmem:[#allocation3 + $0x60] sm:$0xff]  ;;  %v1601_v19 = vld [vmem:[#allocation3 + $0xd8] sm:$0xff]  ;;  %248 = vmatpush.msra.mxu3 %v1593_v16  ;;  %v1605_v20 = vld [vmem:[#allocation3 + $0x170] sm:$0xff]  ;;  %50 = vst [vmem:[#allocation2 + $0x28] sm:$0x3] %v1502_v9 }
   0xc   :  { %91 = vmatpush.msra.mxu0 %v59_v3  ;;  %220 = vmatpush.msra.mxu2 %v1582_v12  ;;  %v1608_v21 = vld [vmem:[#allocation3 + $0x58] sm:$0xff]  ;;  %v1611_v22 = vld [vmem:[#allocation3 + $0xd0] sm:$0xff]  ;;  %v1614_v23 = vld [vmem:[#allocation3 + $0x168] sm:$0xff] }
   0xd   :  { %192 = vmatpush.msra.mxu1 %v1579_v11  ;;  %v1617_v24 = vld [vmem:[#allocation3 + $0x50] sm:$0xff]  ;;  %249 = vmatpush.msra.mxu3 %v1605_v20  ;;  %v1620_v25 = vld [vmem:[#allocation3 + $0xc8] sm:$0xff]  ;;  %v1623_v26 = vld [vmem:[#allocation3 + $0x160] sm:$0xff] }
   0xe   :  { %92 = vmatpush.msra.mxu0 %v58_v4  ;;  %221 = vmatpush.msra.mxu2 %v1585_v13  ;;  %v1626_v27 = vld [vmem:[#allocation3 + $0x48] sm:$0xff]  ;;  %v1629_v28 = vld [vmem:[#allocation3 + $0xc0] sm:$0xff]  ;;  %v1632_v29 = vld [vmem:[#allocation3 + $0x158] sm:$0xff] }
   0xf   :  { %193 = vmatpush.msra.mxu1 %v1590_v15  ;;  %250 = vmatpush.msra.mxu3 %v1614_v23  ;;  %v52_v30 = vld [vmem:[%s2516_s0 + $0x8] sm:$0xff]  ;;  %v1638_v31 = vld [vmem:[#allocation3 + $0x40] sm:$0xff]  ;;  %v1641_v32 = vld [vmem:[#allocation3 + $0xb8] sm:$0xff] }
  0x10   :  { %93 = vmatpush.msra.mxu0 %v57_v5  ;;  %222 = vmatpush.msra.mxu2 %v1599_v18  ;;  %v1644_v33 = vld [vmem:[#allocation3 + $0x150] sm:$0xff]  ;;  %v1647_v34 = vld [vmem:[#allocation3 + $0x38] sm:$0xff]  ;;  %v1658_v37 = vld [vmem:[#allocation3 + $0xa8] sm:$0xff] }
  0x11   :  { %194 = vmatpush.msra.mxu1 %v1601_v19  ;;  %251 = vmatpush.msra.mxu3 %v1623_v26  ;;  %v1651_v35 = vld [vmem:[#allocation3 + $0xb0] sm:$0xff]  ;;  %v1662_v38 = vld [vmem:[#allocation3 + $0xa0] sm:$0xff]  ;;  %v53_v39 = vld [vmem:[%s2516_s0 + $0x10] sm:$0xff] }
  0x12   :  { %94 = vmatpush.msra.mxu0 %v56_v10  ;;  %223 = vmatpush.msra.mxu2 %v1608_v21  ;;  %v1655_v36 = vld [vmem:[#allocation3 + $0x30] sm:$0xff]  ;;  %v1669_v40 = vld [vmem:[#allocation3 + $0x98] sm:$0xff]  ;;  %v54_v42 = vld [vmem:[%s2516_s0 + $0x18] sm:$0xff] }
  0x13   :  { %195 = vmatpush.msra.mxu1 %v1611_v22  ;;  %252 = vmatpush.msra.mxu3 %v1632_v29  ;;  %v1673_v41 = vld [vmem:[#allocation3 + $0x90] sm:$0xff]  ;;  %v1681_v43 = vld [vmem:[#allocation3 + $0x88] sm:$0xff]  ;;  %v1690_v46 = vld [vmem:[#allocation3 + $0x80] sm:$0xff] }
  0x14   :  { %95 = vmatpush.msra.mxu0 %v55_v14  ;;  %224 = vmatpush.msra.mxu2 %v1617_v24  ;;  %v1683_v44 = vld [vmem:[#allocation3 + $0x28] sm:$0xff]  ;;  %v1692_v47 = vld [vmem:[#allocation3 + $0x20] sm:$0xff]  ;;  %v1699_v49 = vld [vmem:[#allocation3 + $0x18] sm:$0xff] }
  0x15   :  { %1431 = vmatmul.msk.f32.vlgmr.msra.gmra.mxu0 %vm67_vm0, %v51_v17  ;;  %196 = vmatpush.msra.mxu1 %v1620_v25  ;;  %v1685_v45 = vld [vmem:[#allocation3 + $0x148] sm:$0xff]  ;;  %v1694_v48 = vld [vmem:[#allocation3 + $0x140] sm:$0xff]  ;;  %v1701_v50 = vld [vmem:[#allocation3 + $0x138] sm:$0xff] }
  0x16   :  { %225 = vmatpush.msra.mxu2 %v1626_v27  ;;  %253 = vmatpush.msra.mxu3 %v1644_v33  ;;  %v1703_v51 = vld [vmem:[#allocation3 + $0x10] sm:$0xff]  ;;  %v1713_v53 = vld [vmem:[#allocation3 + $0x8] sm:$0xff]  ;;  %v1720_v55 = vld [vmem:[#allocation3] sm:$0xff] }
  0x17   :  { %197 = vmatpush.msra.mxu1 %v1629_v28  ;;  %v1707_v52 = vld [vmem:[#allocation3 + $0x130] sm:$0xff]  ;;  %v1715_v54 = vld [vmem:[#allocation3 + $0x128] sm:$0xff]  ;;  %v1722_v56 = vld [vmem:[#allocation3 + $0x120] sm:$0xff] }
  0x18   :  { %226 = vmatpush.msra.mxu2 %v1638_v31  ;;  %254 = vmatpush.msra.mxu3 %v1685_v45  ;;  %v1727_v57 = vld [vmem:[#allocation3 + $0x118] sm:$0xff]  ;;  %v1730_v58 = vld [vmem:[#allocation3 + $0x110] sm:$0xff]  ;;  %v1737_v59 = vld [vmem:[#allocation3 + $0x108] sm:$0xff] }
  0x19   :  { %198 = vmatpush.msra.mxu1 %v1641_v32  ;;  %v1742_v60 = vld [vmem:[#allocation3 + $0x100] sm:$0xff]  ;;  %v1442_v61 = vld [vmem:[%s2518_s2] ss:$0 sm:$0xff] }
  0x1a   :  { %227 = vmatpush.msra.mxu2 %v1647_v34  ;;  %255 = vmatpush.msra.mxu3 %v1694_v48  ;;  %v1853_v14 = vld [vmem:[%s2523_s7 + $0x78] sm:$0xff]  ;;  %v1871_v17 = vld [vmem:[%s2523_s7 + $0x60] sm:$0xff] }
  0x1b   :  { %199 = vmatpush.msra.mxu1 %v1651_v35  ;;  %312 = vmatpush.msrb.mxu0 %v1853_v14 }
  0x1c   :  { %228 = vmatpush.msra.mxu2 %v1655_v36  ;;  %256 = vmatpush.msra.mxu3 %v1701_v50 }
  0x1d   :  { %1432 = vmatmul.msk.f32.gmra.mxu0 %vm67_vm0, %v52_v30  ;;  %200 = vmatpush.msra.mxu1 %v1658_v37  ;;  %v1918_v30 = vld [vmem:[%s2523_s7 + $0x20] sm:$0xff] }
  0x1e   :  { %229 = vmatpush.msra.mxu2 %v1683_v44  ;;  %257 = vmatpush.msra.mxu3 %v1707_v52 }
  0x1f   :  { %201 = vmatpush.msra.mxu1 %v1662_v38 }
  0x20   :  { %230 = vmatpush.msra.mxu2 %v1692_v47  ;;  %258 = vmatpush.msra.mxu3 %v1715_v54 }
  0x21   :  { %202 = vmatpush.msra.mxu1 %v1669_v40 }
  0x22   :  { %231 = vmatpush.msra.mxu2 %v1699_v49  ;;  %259 = vmatpush.msra.mxu3 %v1722_v56 }
  0x23   :  { %203 = vmatpush.msra.mxu1 %v1673_v41 }
  0x24   :  { %232 = vmatpush.msra.mxu2 %v1703_v51  ;;  %260 = vmatpush.msra.mxu3 %v1727_v57 }
  0x25   :  { %1433 = vmatmul.msk.f32.gmra.mxu0 %vm67_vm0, %v53_v39  ;;  %204 = vmatpush.msra.mxu1 %v1681_v43 }
  0x26   :  { %233 = vmatpush.msra.mxu2 %v1713_v53  ;;  %261 = vmatpush.msra.mxu3 %v1730_v58 }
  0x27   :  { %205 = vmatpush.msra.mxu1 %v1690_v46 }
  0x28   :  { %234 = vmatpush.msra.mxu2 %v1720_v55  ;;  %262 = vmatpush.msra.mxu3 %v1737_v59 }
  0x29   :  { %392 = vmatpush.msrb.mxu1 %v1569_v6 }
  0x2a   :  { %421 = vmatpush.msrb.mxu2 %v1574_v8  ;;  %263 = vmatpush.msra.mxu3 %v1742_v60 }
  0x2b   :  { %393 = vmatpush.msrb.mxu1 %v1571_v7 }
  0x2c   :  { %422 = vmatpush.msrb.mxu2 %v1582_v12  ;;  %450 = vmatpush.msrb.mxu3 %v1593_v16 }
  0x2d   :  { %1434 = vmatmul.msk.f32.gmra.mxu0 %vm67_vm0, %v54_v42  ;;  %394 = vmatpush.msrb.mxu1 %v1579_v11 }
  0x2e   :  { %423 = vmatpush.msrb.mxu2 %v1585_v13  ;;  %451 = vmatpush.msrb.mxu3 %v1605_v20 }
  0x2f   :  { %395 = vmatpush.msrb.mxu1 %v1590_v15 }
  0x30   :  { %424 = vmatpush.msrb.mxu2 %v1599_v18  ;;  %452 = vmatpush.msrb.mxu3 %v1614_v23 }
  0x31   :  { %396 = vmatpush.msrb.mxu1 %v1601_v19 }
  0x32   :  { %425 = vmatpush.msrb.mxu2 %v1608_v21  ;;  %453 = vmatpush.msrb.mxu3 %v1623_v26 }
  0x33   :  { %397 = vmatpush.msrb.mxu1 %v1611_v22 }
  0x34   :  { %426 = vmatpush.msrb.mxu2 %v1617_v24  ;;  %454 = vmatpush.msrb.mxu3 %v1632_v29 }
  0x35   :  { %398 = vmatpush.msrb.mxu1 %v1620_v25 }
  0x36   :  { %427 = vmatpush.msrb.mxu2 %v1626_v27  ;;  %455 = vmatpush.msrb.mxu3 %v1644_v33 }
  0x37   :  { %399 = vmatpush.msrb.mxu1 %v1629_v28 }
  0x38   :  { %428 = vmatpush.msrb.mxu2 %v1638_v31  ;;  %456 = vmatpush.msrb.mxu3 %v1685_v45 }
  0x39   :  { %400 = vmatpush.msrb.mxu1 %v1641_v32 }
  0x3a   :  { %429 = vmatpush.msrb.mxu2 %v1647_v34  ;;  %457 = vmatpush.msrb.mxu3 %v1694_v48 }
  0x3b   :  { %401 = vmatpush.msrb.mxu1 %v1651_v35 }
  0x3c   :  { %430 = vmatpush.msrb.mxu2 %v1655_v36  ;;  %458 = vmatpush.msrb.mxu3 %v1701_v50 }
  0x3d   :  { %402 = vmatpush.msrb.mxu1 %v1658_v37 }
  0x3e   :  { %431 = vmatpush.msrb.mxu2 %v1683_v44  ;;  %459 = vmatpush.msrb.mxu3 %v1707_v52 }
  0x3f   :  { %403 = vmatpush.msrb.mxu1 %v1662_v38 }
  0x40   :  { %432 = vmatpush.msrb.mxu2 %v1692_v47  ;;  %460 = vmatpush.msrb.mxu3 %v1715_v54 }
  0x41   :  { %404 = vmatpush.msrb.mxu1 %v1669_v40 }
  0x42   :  { %433 = vmatpush.msrb.mxu2 %v1699_v49  ;;  %461 = vmatpush.msrb.mxu3 %v1722_v56 }
  0x43   :  { %405 = vmatpush.msrb.mxu1 %v1673_v41 }
  0x44   :  { %434 = vmatpush.msrb.mxu2 %v1703_v51  ;;  %462 = vmatpush.msrb.mxu3 %v1727_v57 }
  0x45   :  { %406 = vmatpush.msrb.mxu1 %v1681_v43 }
  0x46   :  { %435 = vmatpush.msrb.mxu2 %v1713_v53  ;;  %463 = vmatpush.msrb.mxu3 %v1730_v58 }
  0x47   :  { %407 = vmatpush.msrb.mxu1 %v1690_v46 }
  0x48   :  { %436 = vmatpush.msrb.mxu2 %v1720_v55  ;;  %464 = vmatpush.msrb.mxu3 %v1737_v59 }
  0x4a   :  { %465 = vmatpush.msrb.mxu3 %v1742_v60 }
  0x92   :  { %v97_v62 = vpop.f32.mrf.mxu0 }
  0x93   :  { %v1771_v63 = vadd.f32 %v1442_v61, %v97_v62 }
  0x95   :  { %178 = vst [vmem:[#allocation2 + $0x1] sm:$0xff] %v1771_v63  ;;  %206 = vmatmul.f32.vlgmr.msra.gmra.mxu1 %v1771_v63 }
  0x96   :  { %590 = vmatpush.msra.mxu1 %v1569_v6 }
  0x98   :  { %591 = vmatpush.msra.mxu1 %v1571_v7 }
  0x9a   :  { %v100_v0 = vpop.f32.mrf.mxu0  ;;  %592 = vmatpush.msra.mxu1 %v1579_v11 }
  0x9b   :  { %v1787_v1 = vadd.f32 %v1442_v61, %v100_v0 }
  0x9c   :  { %v182_v2 = vld [vmem:[#allocation2] sm:$0xff]  ;;  %593 = vmatpush.msra.mxu1 %v1590_v15  ;;  %v1859_v15 = vld [vmem:[%s2523_s7 + $0x70] sm:$0xff] }
  0x9d   :  { %179 = vst [vmem:[#allocation2 + $0x9] sm:$0xff] %v1787_v1  ;;  %209 = vmatmul.f32.gmra.mxu1 %v1787_v1  ;;  %235 = vmatmul.f32.vlgmr.msra.gmra.mxu2 %v182_v2 }
  0x9e   :  { %619 = vmatpush.msra.mxu2 %v1574_v8  ;;  %594 = vmatpush.msra.mxu1 %v1601_v19 }
  0x9f   :  { %313 = vmatpush.msrb.mxu0 %v1859_v15 }
  0xa0   :  { %620 = vmatpush.msra.mxu2 %v1582_v12  ;;  %595 = vmatpush.msra.mxu1 %v1611_v22  ;;  %v1889_v22 = vld [vmem:[%s2523_s7 + $0x48] sm:$0xff] }
  0xa2   :  { %v103_v3 = vpop.f32.mrf.mxu0  ;;  %621 = vmatpush.msra.mxu2 %v1585_v13  ;;  %596 = vmatpush.msra.mxu1 %v1620_v25 }
  0xa3   :  { %v1802_v4 = vadd.f32 %v1442_v61, %v103_v3 }
  0xa4   :  { %v183_v5 = vld [vmem:[#allocation2 + $0x8] sm:$0xff]  ;;  %622 = vmatpush.msra.mxu2 %v1599_v18  ;;  %597 = vmatpush.msra.mxu1 %v1629_v28  ;;  %v1877_v18 = vld [vmem:[%s2523_s7 + $0x58] sm:$0xff]  ;;  %v1913_v28 = vld [vmem:[%s2523_s7 + $0x28] sm:$0xff] }
  0xa5   :  { %v186_v6 = vld [vmem:[#allocation2 + $0x2] sm:$0xff]  ;;  %180 = vst [vmem:[#allocation2 + $0x19] sm:$0xff] %v1802_v4  ;;  %212 = vmatmul.f32.gmra.mxu1 %v1802_v4  ;;  %238 = vmatmul.f32.gmra.mxu2 %v183_v5  ;;  %v187_v10 = vld [vmem:[#allocation2 + $0xa] sm:$0xff] }
  0xa6   :  { %264 = vmatmul.f32.vlgmr.msra.gmra.mxu3 %v186_v6  ;;  %623 = vmatpush.msra.mxu2 %v1608_v21  ;;  %v1883_v21 = vld [vmem:[%s2523_s7 + $0x50] sm:$0xff] }
  0xa7   :  { %648 = vmatpush.msra.mxu3 %v1593_v16  ;;  %598 = vmatpush.msra.mxu1 %v1641_v32  ;;  %v1865_v16 = vld [vmem:[%s2523_s7 + $0x68] sm:$0xff]  ;;  %v1930_v32 = vld [vmem:[%s2523_s7 + $0x10] sm:$0xff] }
  0xa8   :  { %624 = vmatpush.msra.mxu2 %v1617_v24  ;;  %314 = vmatpush.msrb.mxu0 %v1865_v16  ;;  %v1901_v24 = vld [vmem:[%s2523_s7 + $0x38] sm:$0xff] }
  0xa9   :  { %649 = vmatpush.msra.mxu3 %v1605_v20  ;;  %599 = vmatpush.msra.mxu1 %v1651_v35 }
  0xaa   :  { %v106_v7 = vpop.f32.mrf.mxu0  ;;  %625 = vmatpush.msra.mxu2 %v1626_v27  ;;  %315 = vmatpush.msrb.mxu0 %v1871_v17  ;;  %v1907_v27 = vld [vmem:[%s2523_s7 + $0x30] sm:$0xff] }
  0xab   :  { %v1816_v8 = vadd.f32 %v1442_v61, %v106_v7  ;;  %650 = vmatpush.msra.mxu3 %v1614_v23  ;;  %600 = vmatpush.msra.mxu1 %v1658_v37  ;;  %v1895_v23 = vld [vmem:[%s2523_s7 + $0x40] sm:$0xff] }
  0xac   :  { %v184_v9 = vld [vmem:[#allocation2 + $0x18] sm:$0xff]  ;;  %626 = vmatpush.msra.mxu2 %v1638_v31  ;;  %316 = vmatpush.msrb.mxu0 %v1877_v18  ;;  %v1924_v31 = vld [vmem:[%s2523_s7 + $0x18] sm:$0xff] }
  0xad   :  { %181 = vst [vmem:[#allocation2 + $0x21] sm:$0xff] %v1816_v8  ;;  %215 = vmatmul.f32.gmra.mxu1 %v1816_v8  ;;  %241 = vmatmul.f32.gmra.mxu2 %v184_v9 }
  0xae   :  { %267 = vmatmul.f32.gmra.mxu3 %v187_v10  ;;  %601 = vmatpush.msra.mxu1 %v1662_v38 }
  0xaf   :  { %651 = vmatpush.msra.mxu3 %v1623_v26  ;;  %627 = vmatpush.msra.mxu2 %v1647_v34  ;;  %v1936_v34 = vld [vmem:[%s2523_s7 + $0x8] sm:$0xff] }
  0xb0   :  { %602 = vmatpush.msra.mxu1 %v1669_v40  ;;  %317 = vmatpush.msrb.mxu0 %v1883_v21 }
  0xb1   :  { %652 = vmatpush.msra.mxu3 %v1632_v29  ;;  %628 = vmatpush.msra.mxu2 %v1655_v36  ;;  %v1942_v36 = vld [vmem:[%s2523_s7] sm:$0xff] }
  0xb2   :  { %603 = vmatpush.msra.mxu1 %v1673_v41  ;;  %318 = vmatpush.msrb.mxu0 %v1889_v22 }
  0xb3   :  { %653 = vmatpush.msra.mxu3 %v1644_v33  ;;  %629 = vmatpush.msra.mxu2 %v1683_v44  ;;  %v1951_v44 = vld [vmem:[%s2520_s4] ss:$0 sm:$0xff] }
  0xb4   :  { %v185_v11 = vld [vmem:[#allocation2 + $0x20] sm:$0xff]  ;;  %604 = vmatpush.msra.mxu1 %v1681_v43  ;;  %319 = vmatpush.msrb.mxu0 %v1895_v23 }
  0xb5   :  { %v188_v12 = vld [vmem:[#allocation2 + $0x1a] sm:$0xff]  ;;  %244 = vmatmul.f32.gmra.mxu2 %v185_v11  ;;  %654 = vmatpush.msra.mxu3 %v1685_v45  ;;  %v189_v13 = vld [vmem:[#allocation2 + $0x22] sm:$0xff] }
  0xb6   :  { %270 = vmatmul.f32.gmra.mxu3 %v188_v12  ;;  %630 = vmatpush.msra.mxu2 %v1692_v47 }
  0xb7   :  { %655 = vmatpush.msra.mxu3 %v1694_v48  ;;  %605 = vmatpush.msra.mxu1 %v1690_v46 }
  0xb8   :  { %631 = vmatpush.msra.mxu2 %v1699_v49  ;;  %320 = vmatpush.msrb.mxu0 %v1901_v24 }
  0xb9   :  { %656 = vmatpush.msra.mxu3 %v1701_v50 }
  0xba   :  { %632 = vmatpush.msra.mxu2 %v1703_v51  ;;  %321 = vmatpush.msrb.mxu0 %v1907_v27 }
  0xbb   :  { %657 = vmatpush.msra.mxu3 %v1707_v52 }
  0xbc   :  { %633 = vmatpush.msra.mxu2 %v1713_v53  ;;  %322 = vmatpush.msrb.mxu0 %v1913_v28 }
  0xbd   :  { %658 = vmatpush.msra.mxu3 %v1715_v54 }
  0xbe   :  { %273 = vmatmul.f32.gmra.mxu3 %v189_v13  ;;  %634 = vmatpush.msra.mxu2 %v1720_v55 }
  0xbf   :  { %659 = vmatpush.msra.mxu3 %v1722_v56  ;;  %323 = vmatpush.msrb.mxu0 %v1918_v30 }
  0xc1   :  { %660 = vmatpush.msra.mxu3 %v1727_v57  ;;  %324 = vmatpush.msrb.mxu0 %v1924_v31 }
  0xc3   :  { %661 = vmatpush.msra.mxu3 %v1730_v58  ;;  %325 = vmatpush.msrb.mxu0 %v1930_v32 }
  0xc5   :  { %662 = vmatpush.msra.mxu3 %v1737_v59  ;;  %326 = vmatpush.msrb.mxu0 %v1936_v34 }
  0xc7   :  { %663 = vmatpush.msra.mxu3 %v1742_v60  ;;  %327 = vmatpush.msrb.mxu0 %v1942_v36 }
  0xc9   :  { %510 = vmatpush.msra.mxu0 %v1853_v14 }
  0xcb   :  { %511 = vmatpush.msra.mxu0 %v1859_v15 }
  0xcd   :  { %512 = vmatpush.msra.mxu0 %v1865_v16 }
  0xcf   :  { %513 = vmatpush.msra.mxu0 %v1871_v17 }
  0xd1   :  { %514 = vmatpush.msra.mxu0 %v1877_v18 }
  0xd3   :  { %515 = vmatpush.msra.mxu0 %v1883_v21 }
  0xd5   :  { %516 = vmatpush.msra.mxu0 %v1889_v22 }
  0xd7   :  { %517 = vmatpush.msra.mxu0 %v1895_v23 }
  0xd9   :  { %518 = vmatpush.msra.mxu0 %v1901_v24 }
  0xdb   :  { %519 = vmatpush.msra.mxu0 %v1907_v27 }
  0xdd   :  { %520 = vmatpush.msra.mxu0 %v1913_v28 }
  0xdf   :  { %521 = vmatpush.msra.mxu0 %v1918_v30 }
  0xe1   :  { %522 = vmatpush.msra.mxu0 %v1924_v31 }
  0xe3   :  { %523 = vmatpush.msra.mxu0 %v1930_v32 }
  0xe5   :  { %524 = vmatpush.msra.mxu0 %v1936_v34 }
  0xe7   :  { %525 = vmatpush.msra.mxu0 %v1942_v36 }
 0x112   :  { %v207_v20 = vpop.f32.mrf.mxu1 }
 0x11a   :  { %v210_v29 = vpop.f32.mrf.mxu1 }
 0x120   :  { %v236_v19 = vpop.f32.mrf.mxu2 }
 0x121   :  { %v237_v39 = vadd.f32 %v236_v19, %v207_v20 }
 0x122   :  { %v213_v37 = vpop.f32.mrf.mxu1 }
 0x128   :  { %v239_v25 = vpop.f32.mrf.mxu2 }
 0x129   :  { %v265_v26 = vpop.f32.mrf.mxu3  ;;  %v240_v38 = vadd.f32 %v239_v25, %v210_v29 }
 0x12a   :  { %v277_v43 = vadd.f32 %v265_v26, %v237_v39  ;;  %v216_v50 = vpop.f32.mrf.mxu1 }
 0x12c   :  { %v1959_v48 = vadd.f32 %v1951_v44, %v277_v43 }
 0x12e   :  { %v297_v54 = vmul.f32 %v1959_v48, %v1959_v48 }
 0x130   :  { %v242_v35 = vpop.f32.mrf.mxu2 }
 0x131   :  { %v268_v33 = vpop.f32.mrf.mxu3  ;;  %v243_v40 = vadd.f32 %v242_v35, %v213_v37 }
 0x132   :  { %v278_v41 = vadd.f32 %v268_v33, %v240_v38 }
 0x134   :  { %v1955_v46 = vadd.f32 %v1951_v44, %v278_v41 }
 0x136   :  { %v298_v51 = vmul.f32 %v1955_v46, %v1955_v46  ;;  %v288_v55 = vadd.f32 %v1955_v46, %v1959_v48 }
 0x138   :  { %v245_v47 = vpop.f32.mrf.mxu2  ;;  %v301_v58 = vadd.f32 %v298_v51, %v297_v54 }
 0x139   :  { %v271_v42 = vpop.f32.mrf.mxu3  ;;  %v246_v52 = vadd.f32 %v245_v47, %v216_v50 }
 0x13a   :  { %v279_v45 = vadd.f32 %v271_v42, %v243_v40 }
 0x13c   :  { %v1962_v49 = vadd.f32 %v1951_v44, %v279_v45 }
 0x13e   :  { %v299_v56 = vmul.f32 %v1962_v49, %v1962_v49  ;;  %v289_v59 = vadd.f32 %v288_v55, %v1962_v49  ;;  %v2017_v55 = vld [vmem:[%s2522_s6] sm:$0x1] }
 0x140   :  { %v302_v61 = vadd.f32 %v301_v58, %v299_v56 }
 0x141   :  { %v274_v53 = vpop.f32.mrf.mxu3 }
 0x142   :  { %v280_v57 = vadd.f32 %v274_v53, %v246_v52  ;;  %v2011_v52 = vld [vmem:[%s2521_s5] sm:$0x1] }
 0x144   :  { %v1977_v60 = vadd.f32 %v1951_v44, %v280_v57 }
 0x146   :  { %v290_v62 = vadd.f32 %v289_v59, %v1977_v60  ;;  %v300_v0 = vmul.f32 %v1977_v60, %v1977_v60 }
 0x148   :  { %v291_v2 = vrot.slane %v290_v62, 4  ;;  %v303_v3 = vadd.f32 %v302_v61, %v300_v0 }
 0x14a   :  { %v292_v5 = vadd.f32 %v291_v2, %v290_v62  ;;  %v304_v6 = vrot.slane %v303_v3, 4 }
 0x14c   :  { %v293_v7 = vrot.slane %v292_v5, 2  ;;  %v305_v9 = vadd.f32 %v304_v6, %v303_v3 }
 0x14e   :  { %v294_v10 = vadd.f32 %v293_v7, %v292_v5  ;;  %v306_v11 = vrot.slane %v305_v9, 2 }
 0x150   :  { %v295_v12 = vrot.slane %v294_v10, 1  ;;  %v307_v13 = vadd.f32 %v306_v11, %v305_v9 }
 0x152   :  { %v308_v19 = vrot.slane %v307_v13, 1  ;;  %v296_v20 = vadd.f32 %v295_v12, %v294_v10 }
 0x154   :  { %v309_v25 = vadd.f32 %v308_v19, %v307_v13 }
 0x156   :  { %v311_v26 = vsel %vm310_vm1, %v296_v20, %v309_v25 }
 0x157   :  { %328 = vmatmul.f32.vlgmr.msrb.gmra.mxu0 %v311_v26 }
 0x158   :  { %708 = vmatpush.msrb.mxu0 %v1853_v14 }
 0x15a   :  { %709 = vmatpush.msrb.mxu0 %v1859_v15 }
 0x15c   :  { %710 = vmatpush.msrb.mxu0 %v1865_v16 }
 0x15e   :  { %711 = vmatpush.msrb.mxu0 %v1871_v17 }
 0x160   :  { %712 = vmatpush.msrb.mxu0 %v1877_v18 }
 0x162   :  { %713 = vmatpush.msrb.mxu0 %v1883_v21 }
 0x164   :  { %714 = vmatpush.msrb.mxu0 %v1889_v22 }
 0x166   :  { %715 = vmatpush.msrb.mxu0 %v1895_v23 }
 0x168   :  { %716 = vmatpush.msrb.mxu0 %v1901_v24 }
 0x16a   :  { %717 = vmatpush.msrb.mxu0 %v1907_v27 }
 0x16c   :  { %718 = vmatpush.msrb.mxu0 %v1913_v28 }
 0x16e   :  { %719 = vmatpush.msrb.mxu0 %v1918_v30 }
 0x170   :  { %720 = vmatpush.msrb.mxu0 %v1924_v31 }
 0x172   :  { %721 = vmatpush.msrb.mxu0 %v1930_v32 }
 0x174   :  { %722 = vmatpush.msrb.mxu0 %v1936_v34 }
 0x176   :  { %723 = vmatpush.msrb.mxu0 %v1942_v36 }
 0x1d4   :  { %v329_v29 = vpop.f32.mrf.mxu0 }
 0x1d5   :  { %v332_v33 = vmul.f32 0.001953125, %v329_v29 }
 0x1d7   :  { %v333_v35 = vmul.f32 %v332_v33, %v332_v33 }
 0x1d9   :  { %v335_v37 = vrot.slane %v333_v35, 7 }
 0x1db   :  { %v337_v38 = vsub.f32 %v332_v33, %v335_v37 }
 0x1dd   :  { %v338_v39 = vmax.f32 %v337_v38, 0.0 }
 0x1df   :  { %v339_v40 = vadd.f32 1e-05, %v338_v39 }
 0x1e1   :  { %1445 = vrsqrt.f32 %v339_v40  ;;  %vm346_vm3 = vweird.f32 %v339_v40 }
 0x1e7   :  { %v1446_v41 = vpop.eup %1445 }
 0x1e8   :  { %v341_v42 = vmul.f32 %v1446_v41, %v339_v40  ;;  %vm347_vm2 = vweird.f32 %v1446_v41 }
 0x1e9   :  { %vm348_vm4 = vmor %vm346_vm3, %vm347_vm2 }
 0x1ea   :  { %v342_v43 = vmul.f32 %v1446_v41, %v341_v42 }
 0x1ec   :  { %v343_v45 = vmul.f32 0.5, %v342_v43 }
 0x1ee   :  { %v344_v47 = vsub.f32 1.5, %v343_v45 }
 0x1f0   :  { %v345_v50 = vmul.f32 %v1446_v41, %v344_v47 }
 0x1f2   :  { %v349_v51 = vsel %vm348_vm4, %v1446_v41, %v345_v50 }
 0x1f3   :  { %351 = vst [vmem:[#allocation1] sm:$0xff] %v349_v51 }
 0x1fa   :  { %v353_v53 = vld [vmem:[#allocation1 + $0x1] ss:$9 sm:$0xff] }
 0x1fb   :  { %v355_v54 = vmul.f32 %v353_v53, %v2011_v52 }
 0x1fd   :  { %v356_v56 = vmul.f32 %v355_v54, %v332_v33  ;;  %v359_v57 = vperm.slane %v355_v54, 0 }
 0x1ff   :  { %v357_v58 = vsub.f32 %v2017_v55, %v356_v56  ;;  %v361_v59 = vmul.f32 %v359_v57, %v1959_v48  ;;  %v362_v62 = vmul.f32 %v359_v57, %v1955_v46  ;;  %v363_v0 = vmul.f32 %v359_v57, %v1962_v49 }
 0x200   :  { %v364_v2 = vmul.f32 %v359_v57, %v1977_v60 }
 0x201   :  { %v366_v61 = vperm.slane %v357_v58, 0 }
 0x203   :  { %v368_v3 = vadd.f32 %v366_v61, %v361_v59  ;;  %v369_v5 = vadd.f32 %v366_v61, %v362_v62  ;;  %v370_v6 = vadd.f32 %v366_v61, %v363_v0  ;;  %v371_v7 = vadd.f32 %v366_v61, %v364_v2 }
 0x205   :  { %v372_v9 = vmax.f32 %v368_v3, 0.0  ;;  %v373_v10 = vmax.f32 %v369_v5, 0.0  ;;  %v374_v11 = vmax.f32 %v370_v6, 0.0  ;;  %v375_v12 = vmax.f32 %v371_v7, 0.0 }
 0x207   :  { %v376_v13 = vadd.f32 %v372_v9, %v1771_v63  ;;  %v377_v19 = vadd.f32 %v373_v10, %v1787_v1  ;;  %v378_v48 = vadd.f32 %v374_v11, %v1802_v4  ;;  %v379_v46 = vadd.f32 %v375_v12, %v1816_v8 }
 0x209   :  { %380 = vst [vmem:[#allocation2 + $0x1] sm:$0xff] %v376_v13  ;;  %408 = vmatmul.f32.vlgmr.msrb.gmra.mxu1 %v376_v13 }
 0x20a   :  { %381 = vst [vmem:[#allocation2 + $0x9] sm:$0xff] %v377_v19 }
 0x20b   :  { %382 = vst [vmem:[#allocation2 + $0x19] sm:$0xff] %v378_v48 }
 0x20c   :  { %383 = vst [vmem:[#allocation2 + $0x21] sm:$0xff] %v379_v46 }
 0x210   :  { %v384_v49 = vld [vmem:[#allocation2] sm:$0xff] }
 0x211   :  { %411 = vmatmul.f32.gmra.mxu1 %v377_v19  ;;  %437 = vmatmul.f32.vlgmr.msrb.gmra.mxu2 %v384_v49  ;;  %v388_v60 = vld [vmem:[#allocation2 + $0x2] sm:$0xff]  ;;  %v389_v25 = vld [vmem:[#allocation2 + $0xa] sm:$0xff] }
 0x212   :  { %466 = vmatmul.f32.vlgmr.msrb.gmra.mxu3 %v388_v60  ;;  %v385_v20 = vld [vmem:[#allocation2 + $0x8] sm:$0xff]  ;;  %v386_v26 = vld [vmem:[#allocation2 + $0x18] sm:$0xff] }
 0x213   :  { %v390_v29 = vld [vmem:[#allocation2 + $0x1a] sm:$0xff]  ;;  %v391_v35 = vld [vmem:[#allocation2 + $0x22] sm:$0xff] }
 0x214   :  { %v387_v33 = vld [vmem:[#allocation2 + $0x20] sm:$0xff] }
 0x219   :  { %414 = vmatmul.f32.gmra.mxu1 %v378_v48  ;;  %440 = vmatmul.f32.gmra.mxu2 %v385_v20 }
 0x21a   :  { %469 = vmatmul.f32.gmra.mxu3 %v389_v25 }
 0x221   :  { %417 = vmatmul.f32.gmra.mxu1 %v379_v46  ;;  %443 = vmatmul.f32.gmra.mxu2 %v386_v26 }
 0x222   :  { %472 = vmatmul.f32.gmra.mxu3 %v390_v29 }
 0x229   :  { %446 = vmatmul.f32.gmra.mxu2 %v387_v33 }
 0x22a   :  { %475 = vmatmul.f32.gmra.mxu3 %v391_v35 }
 0x286   :  { %v409_v37 = vpop.f32.mrf.mxu1 }
 0x28e   :  { %v412_v40 = vpop.f32.mrf.mxu1 }
 0x294   :  { %v438_v38 = vpop.f32.mrf.mxu2 }
 0x295   :  { %v467_v39 = vpop.f32.mrf.mxu3  ;;  %v439_v47 = vadd.f32 %v438_v38, %v409_v37 }
 0x296   :  { %v415_v45 = vpop.f32.mrf.mxu1 }
 0x297   :  { %v479_v56 = vadd.f32 %v467_v39, %v439_v47 }
 0x299   :  { %v2032_v59 = vadd.f32 %v1951_v44, %v479_v56 }
 0x29b   :  { %v496_v6 = vmul.f32 %v2032_v59, %v2032_v59 }
 0x29c   :  { %v441_v41 = vpop.f32.mrf.mxu2 }
 0x29d   :  { %v470_v42 = vpop.f32.mrf.mxu3  ;;  %v442_v43 = vadd.f32 %v441_v41, %v412_v40 }
 0x29e   :  { %v418_v62 = vpop.f32.mrf.mxu1 }
 0x29f   :  { %v480_v51 = vadd.f32 %v470_v42, %v442_v43 }
 0x2a1   :  { %v2029_v58 = vadd.f32 %v1951_v44, %v480_v51 }
 0x2a3   :  { %v497_v2 = vmul.f32 %v2029_v58, %v2029_v58  ;;  %v487_v7 = vadd.f32 %v2029_v58, %v2032_v59 }
 0x2a4   :  { %v444_v50 = vpop.f32.mrf.mxu2 }
 0x2a5   :  { %v445_v53 = vadd.f32 %v444_v50, %v415_v45  ;;  %v473_v54 = vpop.f32.mrf.mxu3  ;;  %v500_v11 = vadd.f32 %v497_v2, %v496_v6 }
 0x2a7   :  { %v481_v57 = vadd.f32 %v473_v54, %v445_v53 }
 0x2a9   :  { %v2035_v61 = vadd.f32 %v1951_v44, %v481_v57 }
 0x2ab   :  { %v498_v9 = vmul.f32 %v2035_v61, %v2035_v61  ;;  %v488_v12 = vadd.f32 %v487_v7, %v2035_v61 }
 0x2ac   :  { %v447_v0 = vpop.f32.mrf.mxu2 }
 0x2ad   :  { %v448_v3 = vadd.f32 %v447_v0, %v418_v62  ;;  %v476_v5 = vpop.f32.mrf.mxu3  ;;  %v501_v19 = vadd.f32 %v500_v11, %v498_v9 }
 0x2af   :  { %v482_v10 = vadd.f32 %v476_v5, %v448_v3 }
 0x2b1   :  { %v2047_v13 = vadd.f32 %v1951_v44, %v482_v10 }
 0x2b3   :  { %v489_v48 = vadd.f32 %v488_v12, %v2047_v13  ;;  %v499_v46 = vmul.f32 %v2047_v13, %v2047_v13 }
 0x2b5   :  { %v490_v49 = vrot.slane %v489_v48, 4  ;;  %v502_v60 = vadd.f32 %v501_v19, %v499_v46 }
 0x2b7   :  { %v491_v20 = vadd.f32 %v490_v49, %v489_v48  ;;  %v503_v25 = vrot.slane %v502_v60, 4 }
 0x2b9   :  { %v492_v26 = vrot.slane %v491_v20, 2  ;;  %v504_v29 = vadd.f32 %v503_v25, %v502_v60 }
 0x2bb   :  { %v493_v33 = vadd.f32 %v492_v26, %v491_v20  ;;  %v505_v35 = vrot.slane %v504_v29, 2 }
 0x2bd   :  { %v494_v37 = vrot.slane %v493_v33, 1  ;;  %v506_v38 = vadd.f32 %v505_v35, %v504_v29 }
 0x2bf   :  { %v507_v39 = vrot.slane %v506_v38, 1  ;;  %v495_v40 = vadd.f32 %v494_v37, %v493_v33 }
 0x2c1   :  { %v508_v41 = vadd.f32 %v507_v39, %v506_v38 }
 0x2c3   :  { %v509_v42 = vsel %vm310_vm1, %v495_v40, %v508_v41 }
 0x2c4   :  { %526 = vmatmul.f32.vlgmr.msra.gmra.mxu0 %v509_v42 }
 0x2c5   :  { %962 = vmatpush.msra.mxu0 %v1853_v14 }
 0x2c7   :  { %963 = vmatpush.msra.mxu0 %v1859_v15 }
 0x2c9   :  { %964 = vmatpush.msra.mxu0 %v1865_v16 }
 0x2cb   :  { %965 = vmatpush.msra.mxu0 %v1871_v17 }
 0x2cd   :  { %966 = vmatpush.msra.mxu0 %v1877_v18 }
 0x2cf   :  { %967 = vmatpush.msra.mxu0 %v1883_v21 }
 0x2d1   :  { %968 = vmatpush.msra.mxu0 %v1889_v22 }
 0x2d3   :  { %969 = vmatpush.msra.mxu0 %v1895_v23 }
 0x2d5   :  { %970 = vmatpush.msra.mxu0 %v1901_v24 }
 0x2d7   :  { %971 = vmatpush.msra.mxu0 %v1907_v27 }
 0x2d9   :  { %972 = vmatpush.msra.mxu0 %v1913_v28 }
 0x2db   :  { %973 = vmatpush.msra.mxu0 %v1918_v30 }
 0x2dd   :  { %974 = vmatpush.msra.mxu0 %v1924_v31 }
 0x2df   :  { %975 = vmatpush.msra.mxu0 %v1930_v32 }
 0x2e1   :  { %976 = vmatpush.msra.mxu0 %v1936_v34 }
 0x2e3   :  { %977 = vmatpush.msra.mxu0 %v1942_v36 }
 0x341   :  { %v527_v43 = vpop.f32.mrf.mxu0 }
 0x342   :  { %v530_v45 = vmul.f32 0.001953125, %v527_v43 }
 0x344   :  { %v531_v47 = vmul.f32 %v530_v45, %v530_v45 }
 0x346   :  { %v533_v50 = vrot.slane %v531_v47, 7 }
 0x348   :  { %v535_v51 = vsub.f32 %v530_v45, %v533_v50 }
 0x34a   :  { %v536_v53 = vmax.f32 %v535_v51, 0.0 }
 0x34c   :  { %v537_v54 = vadd.f32 1e-05, %v536_v53 }
 0x34e   :  { %1447 = vrsqrt.f32 %v537_v54  ;;  %vm544_vm6 = vweird.f32 %v537_v54 }
 0x354   :  { %v1448_v56 = vpop.eup %1447 }
 0x355   :  { %v539_v57 = vmul.f32 %v1448_v56, %v537_v54  ;;  %vm545_vm5 = vweird.f32 %v1448_v56 }
 0x356   :  { %vm546_vm7 = vmor %vm544_vm6, %vm545_vm5 }
 0x357   :  { %v540_v62 = vmul.f32 %v1448_v56, %v539_v57 }
 0x359   :  { %v541_v0 = vmul.f32 0.5, %v540_v62 }
 0x35b   :  { %v542_v2 = vsub.f32 1.5, %v541_v0 }
 0x35d   :  { %v543_v3 = vmul.f32 %v1448_v56, %v542_v2 }
 0x35f   :  { %v547_v5 = vsel %vm546_vm7, %v1448_v56, %v543_v3 }
 0x360   :  { %549 = vst [vmem:[#allocation1] sm:$0xff] %v547_v5 }
 0x367   :  { %v551_v6 = vld [vmem:[#allocation1 + $0x1] ss:$9 sm:$0xff] }
 0x368   :  { %v553_v7 = vmul.f32 %v551_v6, %v2011_v52 }
 0x36a   :  { %v554_v9 = vmul.f32 %v553_v7, %v530_v45  ;;  %v557_v10 = vperm.slane %v553_v7, 0 }
 0x36c   :  { %v555_v11 = vsub.f32 %v2017_v55, %v554_v9  ;;  %v559_v12 = vmul.f32 %v557_v10, %v2032_v59  ;;  %v560_v48 = vmul.f32 %v557_v10, %v2029_v58  ;;  %v561_v46 = vmul.f32 %v557_v10, %v2035_v61 }
 0x36d   :  { %v562_v49 = vmul.f32 %v557_v10, %v2047_v13 }
 0x36e   :  { %v564_v19 = vperm.slane %v555_v11, 0 }
 0x370   :  { %v566_v60 = vadd.f32 %v564_v19, %v559_v12  ;;  %v567_v20 = vadd.f32 %v564_v19, %v560_v48  ;;  %v568_v25 = vadd.f32 %v564_v19, %v561_v46  ;;  %v569_v26 = vadd.f32 %v564_v19, %v562_v49 }
 0x372   :  { %v570_v29 = vmax.f32 %v566_v60, 0.0  ;;  %v571_v33 = vmax.f32 %v567_v20, 0.0  ;;  %v572_v35 = vmax.f32 %v568_v25, 0.0  ;;  %v573_v37 = vmax.f32 %v569_v26, 0.0 }
 0x374   :  { %v574_v38 = vadd.f32 %v570_v29, %v1771_v63  ;;  %v575_v39 = vadd.f32 %v571_v33, %v1787_v1  ;;  %v576_v59 = vadd.f32 %v572_v35, %v1802_v4  ;;  %v577_v58 = vadd.f32 %v573_v37, %v1816_v8 }
 0x376   :  { %606 = vmatmul.f32.vlgmr.msra.gmra.mxu1 %v574_v38  ;;  %578 = vst [vmem:[#allocation2 + $0x1] sm:$0xff] %v574_v38 }
 0x377   :  { %579 = vst [vmem:[#allocation2 + $0x9] sm:$0xff] %v575_v39 }
 0x378   :  { %580 = vst [vmem:[#allocation2 + $0x19] sm:$0xff] %v576_v59 }
 0x379   :  { %581 = vst [vmem:[#allocation2 + $0x21] sm:$0xff] %v577_v58 }
 0x37d   :  { %v582_v61 = vld [vmem:[#allocation2] sm:$0xff] }
 0x37e   :  { %609 = vmatmul.f32.gmra.mxu1 %v575_v39  ;;  %635 = vmatmul.f32.vlgmr.msra.gmra.mxu2 %v582_v61  ;;  %v586_v13 = vld [vmem:[#allocation2 + $0x2] sm:$0xff]  ;;  %v587_v63 = vld [vmem:[#allocation2 + $0xa] sm:$0xff] }
 0x37f   :  { %664 = vmatmul.f32.vlgmr.msra.gmra.mxu3 %v586_v13  ;;  %v583_v40 = vld [vmem:[#allocation2 + $0x8] sm:$0xff]  ;;  %v584_v1 = vld [vmem:[#allocation2 + $0x18] sm:$0xff] }
 0x380   :  { %v588_v4 = vld [vmem:[#allocation2 + $0x1a] sm:$0xff]  ;;  %v589_v41 = vld [vmem:[#allocation2 + $0x22] sm:$0xff] }
 0x381   :  { %v585_v8 = vld [vmem:[#allocation2 + $0x20] sm:$0xff] }
 0x386   :  { %612 = vmatmul.f32.gmra.mxu1 %v576_v59  ;;  %638 = vmatmul.f32.gmra.mxu2 %v583_v40 }
 0x387   :  { %667 = vmatmul.f32.gmra.mxu3 %v587_v63 }
 0x38e   :  { %615 = vmatmul.f32.gmra.mxu1 %v577_v58  ;;  %641 = vmatmul.f32.gmra.mxu2 %v584_v1 }
 0x38f   :  { %670 = vmatmul.f32.gmra.mxu3 %v588_v4 }
 0x396   :  { %644 = vmatmul.f32.gmra.mxu2 %v585_v8 }
 0x397   :  { %673 = vmatmul.f32.gmra.mxu3 %v589_v41 }
 0x3f3   :  { %v607_v42 = vpop.f32.mrf.mxu1 }
 0x3fb   :  { %v610_v47 = vpop.f32.mrf.mxu1 }
 0x401   :  { %v636_v43 = vpop.f32.mrf.mxu2 }
 0x402   :  { %v665_v45 = vpop.f32.mrf.mxu3  ;;  %v637_v56 = vadd.f32 %v636_v43, %v607_v42  ;;  %v2163_v43 = vld [vmem:[#allocation3 + $0x1e0] sm:$0xff] }
 0x403   :  { %v613_v54 = vpop.f32.mrf.mxu1 }
 0x404   :  { %v677_v3 = vadd.f32 %v665_v45, %v637_v56  ;;  %v2165_v45 = vld [vmem:[#allocation3 + $0x240] sm:$0xff] }
 0x406   :  { %v2083_v7 = vadd.f32 %v1951_v44, %v677_v3  ;;  %v2191_v3 = vld [vmem:[#allocation3 + $0x1c8] sm:$0xff] }
 0x408   :  { %v694_v46 = vmul.f32 %v2083_v7, %v2083_v7 }
 0x409   :  { %v639_v50 = vpop.f32.mrf.mxu2 }
 0x40a   :  { %v668_v51 = vpop.f32.mrf.mxu3  ;;  %v640_v53 = vadd.f32 %v639_v50, %v610_v47  ;;  %v2167_v47 = vld [vmem:[#allocation3 + $0x2e0] sm:$0xff] }
 0x40b   :  { %v616_v10 = vpop.f32.mrf.mxu1 }
 0x40c   :  { %v678_v62 = vadd.f32 %v668_v51, %v640_v53  ;;  %v2172_v51 = vld [vmem:[#allocation3 + $0x1d8] sm:$0xff] }
 0x40d   :  { %v2174_v53 = vld [vmem:[#allocation3 + $0x238] sm:$0xff] }
 0x40e   :  { %v2080_v6 = vadd.f32 %v1951_v44, %v678_v62  ;;  %v2184_v62 = vld [vmem:[#allocation3 + $0x230] sm:$0xff] }
 0x410   :  { %v695_v12 = vmul.f32 %v2080_v6, %v2080_v6  ;;  %v685_v49 = vadd.f32 %v2080_v6, %v2083_v7 }
 0x411   :  { %v642_v57 = vpop.f32.mrf.mxu2 }
 0x412   :  { %v643_v0 = vadd.f32 %v642_v57, %v613_v54  ;;  %v671_v2 = vpop.f32.mrf.mxu3  ;;  %v698_v25 = vadd.f32 %v695_v12, %v694_v46  ;;  %v2176_v54 = vld [vmem:[#allocation3 + $0x2d8] sm:$0xff]  ;;  %v2182_v57 = vld [vmem:[#allocation3 + $0x1d0] sm:$0xff]  ;;  %v2200_v12 = vld [vmem:[#allocation3 + $0x1c0] sm:$0xff] }
 0x413   :  { %v2208_v46 = vld [vmem:[#allocation3 + $0x1b8] sm:$0xff] }
 0x414   :  { %v679_v5 = vadd.f32 %v671_v2, %v643_v0  ;;  %v2186_v0 = vld [vmem:[#allocation3 + $0x2d0] sm:$0xff] }
 0x416   :  { %v2086_v9 = vadd.f32 %v1951_v44, %v679_v5  ;;  %v2193_v5 = vld [vmem:[#allocation3 + $0x228] sm:$0xff] }
 0x418   :  { %v696_v60 = vmul.f32 %v2086_v9, %v2086_v9  ;;  %v686_v26 = vadd.f32 %v685_v49, %v2086_v9  ;;  %v2210_v49 = vld [vmem:[#allocation3 + $0x218] sm:$0xff] }
 0x419   :  { %v645_v11 = vpop.f32.mrf.mxu2 }
 0x41a   :  { %v646_v19 = vadd.f32 %v645_v11, %v616_v10  ;;  %v674_v48 = vpop.f32.mrf.mxu3  ;;  %v699_v33 = vadd.f32 %v698_v25, %v696_v60  ;;  %v2195_v10 = vld [vmem:[#allocation3 + $0x2c8] sm:$0xff]  ;;  %v2212_v60 = vld [vmem:[#allocation3 + $0x2b8] sm:$0xff]  ;;  %v2217_v25 = vld [vmem:[#allocation3 + $0x210] sm:$0xff] }
 0x41c   :  { %v680_v20 = vadd.f32 %v674_v48, %v646_v19  ;;  %v2202_v19 = vld [vmem:[#allocation3 + $0x220] sm:$0xff] }
 0x41d   :  { %v2204_v48 = vld [vmem:[#allocation3 + $0x2c0] sm:$0xff] }
 0x41e   :  { %v2098_v29 = vadd.f32 %v1951_v44, %v680_v20  ;;  %v2215_v20 = vld [vmem:[#allocation3 + $0x1b0] sm:$0xff] }
 0x420   :  { %v687_v35 = vadd.f32 %v686_v26, %v2098_v29  ;;  %v697_v37 = vmul.f32 %v2098_v29, %v2098_v29  ;;  %v2221_v26 = vld [vmem:[#allocation3 + $0x2b0] sm:$0xff] }
 0x422   :  { %v688_v38 = vrot.slane %v687_v35, 4  ;;  %v700_v39 = vadd.f32 %v699_v33, %v697_v37  ;;  %v2224_v33 = vld [vmem:[#allocation3 + $0x1a8] sm:$0xff] }
 0x423   :  { %v2230_v37 = vld [vmem:[#allocation3 + $0x2a8] sm:$0xff] }
 0x424   :  { %v689_v59 = vadd.f32 %v688_v38, %v687_v35  ;;  %v701_v58 = vrot.slane %v700_v39, 4  ;;  %v2226_v35 = vld [vmem:[#allocation3 + $0x208] sm:$0xff]  ;;  %v2233_v38 = vld [vmem:[#allocation3 + $0x1a0] sm:$0xff] }
 0x426   :  { %v690_v61 = vrot.slane %v689_v59, 2  ;;  %v702_v13 = vadd.f32 %v701_v58, %v700_v39  ;;  %v2235_v39 = vld [vmem:[#allocation3 + $0x200] sm:$0xff] }
 0x427   :  { %v2239_v58 = vld [vmem:[#allocation3 + $0x2a0] sm:$0xff] }
 0x428   :  { %v691_v40 = vadd.f32 %v690_v61, %v689_v59  ;;  %v703_v63 = vrot.slane %v702_v13, 2 }
 0x42a   :  { %v692_v1 = vrot.slane %v691_v40, 1  ;;  %v704_v4 = vadd.f32 %v703_v63, %v702_v13  ;;  %v2242_v13 = vld [vmem:[#allocation3 + $0x198] sm:$0xff] }
 0x42c   :  { %v705_v8 = vrot.slane %v704_v4, 1  ;;  %v693_v41 = vadd.f32 %v692_v1, %v691_v40  ;;  %v2246_v40 = vld [vmem:[#allocation3 + $0x298] sm:$0xff]  ;;  %v2249_v1 = vld [vmem:[#allocation3 + $0x190] sm:$0xff] }
 0x42e   :  { %v706_v44 = vadd.f32 %v705_v8, %v704_v4  ;;  %v2253_v4 = vld [vmem:[#allocation3 + $0x290] sm:$0xff] }
 0x430   :  { %v707_v42 = vsel %vm310_vm1, %v693_v41, %v706_v44  ;;  %v2256_v41 = vld [vmem:[#allocation3 + $0x188] sm:$0xff] }
 0x431   :  { %724 = vmatmul.f32.vlgmr.msrb.gmra.mxu0 %v707_v42  ;;  %v2260_v44 = vld [vmem:[#allocation3 + $0x288] sm:$0xff] }
 0x432   :  { %1160 = vmatpush.msrb.mxu0 %v1853_v14  ;;  %v2120_v14 = vld [vmem:[#allocation3 + $0x278] sm:$0xff] }
 0x433   :  { %841 = vmatpush.msrb.mxu1 %v2120_v14 }
 0x434   :  { %1161 = vmatpush.msrb.mxu0 %v1859_v15  ;;  %v2123_v15 = vld [vmem:[#allocation3 + $0x270] sm:$0xff] }
 0x435   :  { %842 = vmatpush.msrb.mxu1 %v2123_v15 }
 0x436   :  { %1162 = vmatpush.msrb.mxu0 %v1865_v16  ;;  %v2126_v16 = vld [vmem:[#allocation3 + $0x268] sm:$0xff] }
 0x437   :  { %843 = vmatpush.msrb.mxu1 %v2126_v16 }
 0x438   :  { %1163 = vmatpush.msrb.mxu0 %v1871_v17  ;;  %v2129_v17 = vld [vmem:[#allocation3 + $0x260] sm:$0xff] }
 0x439   :  { %844 = vmatpush.msrb.mxu1 %v2129_v17 }
 0x43a   :  { %1164 = vmatpush.msrb.mxu0 %v1877_v18  ;;  %v2132_v18 = vld [vmem:[#allocation3 + $0x1f8] sm:$0xff] }
 0x43b   :  { %870 = vmatpush.msrb.mxu2 %v2132_v18 }
 0x43c   :  { %1165 = vmatpush.msrb.mxu0 %v1883_v21  ;;  %v2134_v21 = vld [vmem:[#allocation3 + $0x258] sm:$0xff] }
 0x43d   :  { %845 = vmatpush.msrb.mxu1 %v2134_v21 }
 0x43e   :  { %1166 = vmatpush.msrb.mxu0 %v1889_v22  ;;  %v2136_v22 = vld [vmem:[#allocation3 + $0x2f8] sm:$0xff] }
 0x43f   :  { %899 = vmatpush.msrb.mxu3 %v2136_v22 }
 0x440   :  { %1167 = vmatpush.msrb.mxu0 %v1895_v23 }
 0x442   :  { %1168 = vmatpush.msrb.mxu0 %v1901_v24  ;;  %v2141_v24 = vld [vmem:[#allocation3 + $0x1f0] sm:$0xff] }
 0x443   :  { %871 = vmatpush.msrb.mxu2 %v2141_v24 }
 0x444   :  { %1169 = vmatpush.msrb.mxu0 %v1907_v27  ;;  %v2143_v27 = vld [vmem:[#allocation3 + $0x250] sm:$0xff] }
 0x445   :  { %846 = vmatpush.msrb.mxu1 %v2143_v27 }
 0x446   :  { %1170 = vmatpush.msrb.mxu0 %v1913_v28  ;;  %v2145_v28 = vld [vmem:[#allocation3 + $0x2f0] sm:$0xff] }
 0x447   :  { %900 = vmatpush.msrb.mxu3 %v2145_v28 }
 0x448   :  { %1171 = vmatpush.msrb.mxu0 %v1918_v30 }
 0x44a   :  { %1172 = vmatpush.msrb.mxu0 %v1924_v31  ;;  %v2152_v31 = vld [vmem:[#allocation3 + $0x1e8] sm:$0xff] }
 0x44b   :  { %872 = vmatpush.msrb.mxu2 %v2152_v31 }
 0x44c   :  { %1173 = vmatpush.msrb.mxu0 %v1930_v32  ;;  %v2154_v32 = vld [vmem:[#allocation3 + $0x248] sm:$0xff] }
 0x44d   :  { %847 = vmatpush.msrb.mxu1 %v2154_v32  ;;  %873 = vmatpush.msrb.mxu2 %v2163_v43 }
 0x44e   :  { %1174 = vmatpush.msrb.mxu0 %v1936_v34  ;;  %v2156_v34 = vld [vmem:[#allocation3 + $0x2e8] sm:$0xff] }
 0x44f   :  { %901 = vmatpush.msrb.mxu3 %v2156_v34  ;;  %848 = vmatpush.msrb.mxu1 %v2165_v45 }
 0x450   :  { %1175 = vmatpush.msrb.mxu0 %v1942_v36  ;;  %874 = vmatpush.msrb.mxu2 %v2172_v51 }
 0x451   :  { %902 = vmatpush.msrb.mxu3 %v2167_v47  ;;  %849 = vmatpush.msrb.mxu1 %v2174_v53 }
 0x452   :  { %875 = vmatpush.msrb.mxu2 %v2182_v57 }
 0x453   :  { %903 = vmatpush.msrb.mxu3 %v2176_v54  ;;  %850 = vmatpush.msrb.mxu1 %v2184_v62 }
 0x454   :  { %876 = vmatpush.msrb.mxu2 %v2191_v3 }
 0x455   :  { %904 = vmatpush.msrb.mxu3 %v2186_v0  ;;  %851 = vmatpush.msrb.mxu1 %v2193_v5 }
 0x456   :  { %877 = vmatpush.msrb.mxu2 %v2200_v12 }
 0x457   :  { %905 = vmatpush.msrb.mxu3 %v2195_v10  ;;  %852 = vmatpush.msrb.mxu1 %v2202_v19 }
 0x458   :  { %878 = vmatpush.msrb.mxu2 %v2208_v46 }
 0x459   :  { %906 = vmatpush.msrb.mxu3 %v2204_v48  ;;  %853 = vmatpush.msrb.mxu1 %v2210_v49 }
 0x45a   :  { %879 = vmatpush.msrb.mxu2 %v2215_v20 }
 0x45b   :  { %907 = vmatpush.msrb.mxu3 %v2212_v60  ;;  %854 = vmatpush.msrb.mxu1 %v2217_v25 }
 0x45c   :  { %880 = vmatpush.msrb.mxu2 %v2224_v33 }
 0x45d   :  { %908 = vmatpush.msrb.mxu3 %v2221_v26  ;;  %855 = vmatpush.msrb.mxu1 %v2226_v35 }
 0x45e   :  { %881 = vmatpush.msrb.mxu2 %v2233_v38 }
 0x45f   :  { %909 = vmatpush.msrb.mxu3 %v2230_v37  ;;  %856 = vmatpush.msrb.mxu1 %v2235_v39 }
 0x460   :  { %882 = vmatpush.msrb.mxu2 %v2242_v13 }
 0x461   :  { %910 = vmatpush.msrb.mxu3 %v2239_v58  ;;  %1042 = vmatpush.msra.mxu1 %v2120_v14 }
 0x462   :  { %883 = vmatpush.msrb.mxu2 %v2249_v1 }
 0x463   :  { %911 = vmatpush.msrb.mxu3 %v2246_v40  ;;  %1043 = vmatpush.msra.mxu1 %v2123_v15 }
 0x464   :  { %884 = vmatpush.msrb.mxu2 %v2256_v41 }
 0x465   :  { %912 = vmatpush.msrb.mxu3 %v2253_v4  ;;  %1044 = vmatpush.msra.mxu1 %v2126_v16 }
 0x467   :  { %913 = vmatpush.msrb.mxu3 %v2260_v44  ;;  %1045 = vmatpush.msra.mxu1 %v2129_v17 }
 0x469   :  { %1046 = vmatpush.msra.mxu1 %v2134_v21 }
 0x46b   :  { %1047 = vmatpush.msra.mxu1 %v2143_v27 }
 0x46d   :  { %1048 = vmatpush.msra.mxu1 %v2154_v32 }
 0x46f   :  { %1049 = vmatpush.msra.mxu1 %v2165_v45 }
 0x471   :  { %1050 = vmatpush.msra.mxu1 %v2174_v53 }
 0x473   :  { %1051 = vmatpush.msra.mxu1 %v2184_v62 }
 0x475   :  { %1052 = vmatpush.msra.mxu1 %v2193_v5 }
 0x477   :  { %1053 = vmatpush.msra.mxu1 %v2202_v19 }
 0x479   :  { %1054 = vmatpush.msra.mxu1 %v2210_v49 }
 0x47b   :  { %1055 = vmatpush.msra.mxu1 %v2217_v25 }
 0x47d   :  { %1056 = vmatpush.msra.mxu1 %v2226_v35 }
 0x47f   :  { %1057 = vmatpush.msra.mxu1 %v2235_v39 }
 0x4ae   :  { %v725_v23 = vpop.f32.mrf.mxu0 }
 0x4af   :  { %v2147_v30 = vmul.f32 0.001953125, %v725_v23  ;;  %v2263_v23 = vld [vmem:[#allocation3 + $0x180] sm:$0xff] }
 0x4b0   :  { %885 = vmatpush.msrb.mxu2 %v2263_v23 }
 0x4b1   :  { %v729_v36 = vmul.f32 %v2147_v30, %v2147_v30 }
 0x4b2   :  { %1071 = vmatpush.msra.mxu2 %v2132_v18 }
 0x4b3   :  { %v731_v50 = vrot.slane %v729_v36, 7  ;;  %v2267_v36 = vld [vmem:[#allocation3 + $0x280] sm:$0xff] }
 0x4b4   :  { %914 = vmatpush.msrb.mxu3 %v2267_v36  ;;  %1072 = vmatpush.msra.mxu2 %v2141_v24 }
 0x4b5   :  { %v733_v56 = vsub.f32 %v2147_v30, %v731_v50 }
 0x4b6   :  { %1100 = vmatpush.msra.mxu3 %v2136_v22  ;;  %1073 = vmatpush.msra.mxu2 %v2152_v31 }
 0x4b7   :  { %v734_v2 = vmax.f32 %v733_v56, 0.0 }
 0x4b8   :  { %1101 = vmatpush.msra.mxu3 %v2145_v28  ;;  %1074 = vmatpush.msra.mxu2 %v2163_v43 }
 0x4b9   :  { %v735_v11 = vadd.f32 1e-05, %v734_v2 }
 0x4ba   :  { %1102 = vmatpush.msra.mxu3 %v2156_v34  ;;  %1075 = vmatpush.msra.mxu2 %v2172_v51 }
 0x4bb   :  { %1449 = vrsqrt.f32 %v735_v11  ;;  %vm742_vm9 = vweird.f32 %v735_v11 }
 0x4bc   :  { %1103 = vmatpush.msra.mxu3 %v2167_v47  ;;  %1076 = vmatpush.msra.mxu2 %v2182_v57 }
 0x4be   :  { %1104 = vmatpush.msra.mxu3 %v2176_v54  ;;  %1077 = vmatpush.msra.mxu2 %v2191_v3 }
 0x4c0   :  { %1105 = vmatpush.msra.mxu3 %v2186_v0  ;;  %1078 = vmatpush.msra.mxu2 %v2200_v12 }
 0x4c1   :  { %v1450_v59 = vpop.eup %1449 }
 0x4c2   :  { %v737_v61 = vmul.f32 %v1450_v59, %v735_v11  ;;  %vm743_vm8 = vweird.f32 %v1450_v59  ;;  %1106 = vmatpush.msra.mxu3 %v2195_v10  ;;  %1079 = vmatpush.msra.mxu2 %v2208_v46 }
 0x4c3   :  { %vm744_vm10 = vmor %vm742_vm9, %vm743_vm8 }
 0x4c4   :  { %v738_v63 = vmul.f32 %v1450_v59, %v737_v61  ;;  %1107 = vmatpush.msra.mxu3 %v2204_v48  ;;  %1080 = vmatpush.msra.mxu2 %v2215_v20 }
 0x4c6   :  { %v739_v8 = vmul.f32 0.5, %v738_v63  ;;  %1108 = vmatpush.msra.mxu3 %v2212_v60  ;;  %1081 = vmatpush.msra.mxu2 %v2224_v33 }
 0x4c8   :  { %v740_v42 = vsub.f32 1.5, %v739_v8  ;;  %1109 = vmatpush.msra.mxu3 %v2221_v26  ;;  %1082 = vmatpush.msra.mxu2 %v2233_v38 }
 0x4ca   :  { %v741_v50 = vmul.f32 %v1450_v59, %v740_v42  ;;  %1110 = vmatpush.msra.mxu3 %v2230_v37  ;;  %1083 = vmatpush.msra.mxu2 %v2242_v13 }
 0x4cc   :  { %v745_v56 = vsel %vm744_vm10, %v1450_v59, %v741_v50  ;;  %1111 = vmatpush.msra.mxu3 %v2239_v58  ;;  %1084 = vmatpush.msra.mxu2 %v2249_v1 }
 0x4cd   :  { %747 = vst [vmem:[#allocation1] sm:$0xff] %v745_v56 }
 0x4ce   :  { %1112 = vmatpush.msra.mxu3 %v2246_v40  ;;  %1085 = vmatpush.msra.mxu2 %v2256_v41 }
 0x4d0   :  { %1113 = vmatpush.msra.mxu3 %v2253_v4  ;;  %1086 = vmatpush.msra.mxu2 %v2263_v23 }
 0x4d2   :  { %1114 = vmatpush.msra.mxu3 %v2260_v44 }
 0x4d4   :  { %v749_v2 = vld [vmem:[#allocation1 + $0x1] ss:$9 sm:$0xff]  ;;  %1115 = vmatpush.msra.mxu3 %v2267_v36 }
 0x4d5   :  { %v751_v11 = vmul.f32 %v749_v2, %v2011_v52 }
 0x4d7   :  { %v752_v59 = vmul.f32 %v751_v11, %v2147_v30  ;;  %v755_v61 = vperm.slane %v751_v11, 0 }
 0x4d9   :  { %v753_v63 = vsub.f32 %v2017_v55, %v752_v59  ;;  %v757_v52 = vmul.f32 %v755_v61, %v2083_v7  ;;  %v758_v30 = vmul.f32 %v755_v61, %v2080_v6  ;;  %v759_v42 = vmul.f32 %v755_v61, %v2086_v9 }
 0x4da   :  { %v760_v50 = vmul.f32 %v755_v61, %v2098_v29 }
 0x4db   :  { %v762_v8 = vperm.slane %v753_v63, 0 }
 0x4dd   :  { %v764_v55 = vadd.f32 %v762_v8, %v757_v52  ;;  %v765_v56 = vadd.f32 %v762_v8, %v758_v30  ;;  %v766_v7 = vadd.f32 %v762_v8, %v759_v42  ;;  %v767_v2 = vadd.f32 %v762_v8, %v760_v50 }
 0x4df   :  { %v2308_v6 = vmax.f32 %v764_v55, 0.0  ;;  %v2310_v9 = vmax.f32 %v765_v56, 0.0  ;;  %v2312_v29 = vmax.f32 %v766_v7, 0.0  ;;  %v2315_v11 = vmax.f32 %v767_v2, 0.0  ;;  %v1457_v55 = vld [vmem:[%s2523_s7 + $0x78] sm:$0xff]  ;;  %v1458_v56 = vld [vmem:[%s2523_s7 + $0x70] sm:$0xff] }
 0x4e0   :  { %v1459_v7 = vld [vmem:[%s2523_s7 + $0x68] sm:$0xff]  ;;  %v1460_v2 = vld [vmem:[%s2523_s7 + $0x60] sm:$0xff] }
 0x4e1   :  { %857 = vmatmul.f32.vlgmr.msrb.gmra.mxu1 %v2308_v6  ;;  %829 = vst [vmem:[#allocation2 + $0x1] sm:$0xff] %v2308_v6 }
 0x4e2   :  { %830 = vst [vmem:[#allocation2 + $0x9] sm:$0xff] %v2310_v9  ;;  %1240 = vmatpush.msrb.mxu1 %v2120_v14 }
 0x4e3   :  { %831 = vst [vmem:[#allocation2 + $0x19] sm:$0xff] %v2312_v29 }
 0x4e4   :  { %832 = vst [vmem:[#allocation2 + $0x21] sm:$0xff] %v2315_v11  ;;  %1241 = vmatpush.msrb.mxu1 %v2123_v15 }
 0x4e6   :  { %1242 = vmatpush.msrb.mxu1 %v2126_v16 }
 0x4e8   :  { %v833_v59 = vld [vmem:[#allocation2] sm:$0xff]  ;;  %1243 = vmatpush.msrb.mxu1 %v2129_v17 }
 0x4e9   :  { %860 = vmatmul.f32.gmra.mxu1 %v2310_v9  ;;  %886 = vmatmul.f32.vlgmr.msrb.gmra.mxu2 %v833_v59  ;;  %v837_v61 = vld [vmem:[#allocation2 + $0x2] sm:$0xff]  ;;  %v838_v15 = vld [vmem:[#allocation2 + $0xa] sm:$0xff] }
 0x4ea   :  { %915 = vmatmul.f32.vlgmr.msrb.gmra.mxu3 %v837_v61  ;;  %1269 = vmatpush.msrb.mxu2 %v2132_v18  ;;  %v834_v14 = vld [vmem:[#allocation2 + $0x8] sm:$0xff]  ;;  %v835_v16 = vld [vmem:[#allocation2 + $0x18] sm:$0xff]  ;;  %v1461_v59 = vld [vmem:[%s2523_s7 + $0x58] sm:$0xff] }
 0x4eb   :  { %1298 = vmatpush.msrb.mxu3 %v2136_v22  ;;  %1244 = vmatpush.msrb.mxu1 %v2134_v21  ;;  %v839_v17 = vld [vmem:[#allocation2 + $0x1a] sm:$0xff]  ;;  %v840_v21 = vld [vmem:[#allocation2 + $0x22] sm:$0xff] }
 0x4ec   :  { %1270 = vmatpush.msrb.mxu2 %v2141_v24  ;;  %v836_v18 = vld [vmem:[#allocation2 + $0x20] sm:$0xff]  ;;  %v1462_v61 = vld [vmem:[%s2523_s7 + $0x50] sm:$0xff] }
 0x4ed   :  { %1299 = vmatpush.msrb.mxu3 %v2145_v28  ;;  %1245 = vmatpush.msrb.mxu1 %v2143_v27 }
 0x4ee   :  { %1271 = vmatpush.msrb.mxu2 %v2152_v31 }
 0x4ef   :  { %1300 = vmatpush.msrb.mxu3 %v2156_v34  ;;  %1246 = vmatpush.msrb.mxu1 %v2154_v32 }
 0x4f0   :  { %1272 = vmatpush.msrb.mxu2 %v2163_v43 }
 0x4f1   :  { %863 = vmatmul.f32.gmra.mxu1 %v2312_v29  ;;  %889 = vmatmul.f32.gmra.mxu2 %v834_v14  ;;  %v1463_v14 = vld [vmem:[%s2523_s7 + $0x48] sm:$0xff] }
 0x4f2   :  { %918 = vmatmul.f32.gmra.mxu3 %v838_v15  ;;  %1247 = vmatpush.msrb.mxu1 %v2165_v45  ;;  %v1464_v15 = vld [vmem:[%s2523_s7 + $0x40] sm:$0xff] }
 0x4f3   :  { %1301 = vmatpush.msrb.mxu3 %v2167_v47  ;;  %1273 = vmatpush.msrb.mxu2 %v2172_v51 }
 0x4f4   :  { %1248 = vmatpush.msrb.mxu1 %v2174_v53 }
 0x4f5   :  { %1302 = vmatpush.msrb.mxu3 %v2176_v54  ;;  %1274 = vmatpush.msrb.mxu2 %v2182_v57 }
 0x4f6   :  { %1249 = vmatpush.msrb.mxu1 %v2184_v62  ;;  %v2391_v62 = vld [vmem:[%s2520_s4 + $0x1] ss:$0 sm:$0xff] }
 0x4f7   :  { %1303 = vmatpush.msrb.mxu3 %v2186_v0  ;;  %1275 = vmatpush.msrb.mxu2 %v2191_v3 }
 0x4f8   :  { %1250 = vmatpush.msrb.mxu1 %v2193_v5 }
 0x4f9   :  { %866 = vmatmul.f32.gmra.mxu1 %v2315_v11  ;;  %892 = vmatmul.f32.gmra.mxu2 %v835_v16  ;;  %v1465_v16 = vld [vmem:[%s2523_s7 + $0x38] sm:$0xff] }
 0x4fa   :  { %921 = vmatmul.f32.gmra.mxu3 %v839_v17  ;;  %1276 = vmatpush.msrb.mxu2 %v2200_v12  ;;  %v1466_v17 = vld [vmem:[%s2523_s7 + $0x30] sm:$0xff] }
 0x4fb   :  { %1304 = vmatpush.msrb.mxu3 %v2195_v10  ;;  %1251 = vmatpush.msrb.mxu1 %v2202_v19 }
 0x4fc   :  { %1277 = vmatpush.msrb.mxu2 %v2208_v46 }
 0x4fd   :  { %1305 = vmatpush.msrb.mxu3 %v2204_v48  ;;  %1252 = vmatpush.msrb.mxu1 %v2210_v49 }
 0x4fe   :  { %1278 = vmatpush.msrb.mxu2 %v2215_v20 }
 0x4ff   :  { %1306 = vmatpush.msrb.mxu3 %v2212_v60  ;;  %1253 = vmatpush.msrb.mxu1 %v2217_v25 }
 0x500   :  { %1279 = vmatpush.msrb.mxu2 %v2224_v33 }
 0x501   :  { %895 = vmatmul.f32.gmra.mxu2 %v836_v18  ;;  %1307 = vmatpush.msrb.mxu3 %v2221_v26  ;;  %v1467_v18 = vld [vmem:[%s2523_s7 + $0x28] sm:$0xff] }
 0x502   :  { %924 = vmatmul.f32.gmra.mxu3 %v840_v21  ;;  %1254 = vmatpush.msrb.mxu1 %v2226_v35  ;;  %v1468_v21 = vld [vmem:[%s2523_s7 + $0x20] sm:$0xff] }
 0x503   :  { %1280 = vmatpush.msrb.mxu2 %v2233_v38  ;;  %1308 = vmatpush.msrb.mxu3 %v2230_v37 }
 0x504   :  { %1255 = vmatpush.msrb.mxu1 %v2235_v39 }
 0x505   :  { %1281 = vmatpush.msrb.mxu2 %v2242_v13  ;;  %1309 = vmatpush.msrb.mxu3 %v2239_v58 }
 0x507   :  { %1282 = vmatpush.msrb.mxu2 %v2249_v1  ;;  %1310 = vmatpush.msrb.mxu3 %v2246_v40 }
 0x509   :  { %1283 = vmatpush.msrb.mxu2 %v2256_v41  ;;  %1311 = vmatpush.msrb.mxu3 %v2253_v4 }
 0x50b   :  { %1284 = vmatpush.msrb.mxu2 %v2263_v23  ;;  %1312 = vmatpush.msrb.mxu3 %v2260_v44 }
 0x50d   :  { %1313 = vmatpush.msrb.mxu3 %v2267_v36 }
 0x55e   :  { %v858_v22 = vpop.f32.mrf.mxu1 }
 0x566   :  { %v861_v28 = vpop.f32.mrf.mxu1 }
 0x56c   :  { %v887_v24 = vpop.f32.mrf.mxu2 }
 0x56d   :  { %v916_v27 = vpop.f32.mrf.mxu3  ;;  %v888_v45 = vadd.f32 %v887_v24, %v858_v22  ;;  %v1469_v22 = vld [vmem:[%s2523_s7 + $0x18] sm:$0xff]  ;;  %v1470_v24 = vld [vmem:[%s2523_s7 + $0x10] sm:$0xff] }
 0x56e   :  { %v864_v43 = vpop.f32.mrf.mxu1 }
 0x56f   :  { %v928_v57 = vadd.f32 %v916_v27, %v888_v45  ;;  %v1471_v27 = vld [vmem:[%s2523_s7 + $0x8] sm:$0xff] }
 0x571   :  { %v2397_v5 = vadd.f32 %v2391_v62, %v928_v57 }
 0x573   :  { %v948_v60 = vmul.f32 %v2397_v5, %v2397_v5 }
 0x574   :  { %v890_v31 = vpop.f32.mrf.mxu2 }
 0x575   :  { %v919_v32 = vpop.f32.mrf.mxu3  ;;  %v891_v34 = vadd.f32 %v890_v31, %v861_v28  ;;  %v1472_v28 = vld [vmem:[%s2523_s7] sm:$0xff] }
 0x576   :  { %v867_v12 = vpop.f32.mrf.mxu1 }
 0x577   :  { %v929_v51 = vadd.f32 %v919_v32, %v891_v34 }
 0x579   :  { %v2394_v3 = vadd.f32 %v2391_v62, %v929_v51 }
 0x57b   :  { %v949_v48 = vmul.f32 %v2394_v3, %v2394_v3  ;;  %v939_v20 = vadd.f32 %v2394_v3, %v2397_v5 }
 0x57c   :  { %v893_v47 = vpop.f32.mrf.mxu2 }
 0x57d   :  { %v894_v53 = vadd.f32 %v893_v47, %v864_v43  ;;  %v922_v54 = vpop.f32.mrf.mxu3  ;;  %v952_v33 = vadd.f32 %v949_v48, %v948_v60 }
 0x57f   :  { %v930_v0 = vadd.f32 %v922_v54, %v894_v53 }
 0x581   :  { %v2400_v10 = vadd.f32 %v2391_v62, %v930_v0 }
 0x583   :  { %v950_v25 = vmul.f32 %v2400_v10, %v2400_v10  ;;  %v940_v35 = vadd.f32 %v939_v20, %v2400_v10  ;;  %v2475_v20 = vld [vmem:[%s2522_s6 + $0x1] sm:$0x1] }
 0x584   :  { %v896_v19 = vpop.f32.mrf.mxu2 }
 0x585   :  { %v897_v46 = vadd.f32 %v896_v19, %v867_v12  ;;  %v925_v49 = vpop.f32.mrf.mxu3  ;;  %v953_v38 = vadd.f32 %v952_v33, %v950_v25 }
 0x587   :  { %v931_v26 = vadd.f32 %v925_v49, %v897_v46  ;;  %v2469_v46 = vld [vmem:[%s2521_s5 + $0x1] sm:$0x1] }
 0x589   :  { %v2412_v37 = vadd.f32 %v2391_v62, %v931_v26 }
 0x58b   :  { %v941_v39 = vadd.f32 %v940_v35, %v2412_v37  ;;  %v951_v58 = vmul.f32 %v2412_v37, %v2412_v37 }
 0x58d   :  { %v942_v13 = vrot.slane %v941_v39, 4  ;;  %v954_v40 = vadd.f32 %v953_v38, %v951_v58 }
 0x58f   :  { %v943_v1 = vadd.f32 %v942_v13, %v941_v39  ;;  %v955_v4 = vrot.slane %v954_v40, 4 }
 0x591   :  { %v944_v41 = vrot.slane %v943_v1, 2  ;;  %v956_v44 = vadd.f32 %v955_v4, %v954_v40 }
 0x593   :  { %v945_v23 = vadd.f32 %v944_v41, %v943_v1  ;;  %v957_v36 = vrot.slane %v956_v44, 2 }
 0x595   :  { %v946_v63 = vrot.slane %v945_v23, 1  ;;  %v958_v52 = vadd.f32 %v957_v36, %v956_v44 }
 0x597   :  { %v959_v8 = vrot.slane %v958_v52, 1  ;;  %v947_v30 = vadd.f32 %v946_v63, %v945_v23 }
 0x599   :  { %v960_v42 = vadd.f32 %v959_v8, %v958_v52 }
 0x59b   :  { %v961_v50 = vsel %vm310_vm1, %v947_v30, %v960_v42 }
 0x59c   :  { %978 = vmatmul.f32.vlgmr.msra.gmra.mxu0 %v961_v50 }
 0x59d   :  { %1358 = vmatpush.msra.mxu0 %v1457_v55 }
 0x59f   :  { %1359 = vmatpush.msra.mxu0 %v1458_v56 }
 0x5a1   :  { %1360 = vmatpush.msra.mxu0 %v1459_v7 }
 0x5a3   :  { %1361 = vmatpush.msra.mxu0 %v1460_v2 }
 0x5a5   :  { %1362 = vmatpush.msra.mxu0 %v1461_v59 }
 0x5a7   :  { %1363 = vmatpush.msra.mxu0 %v1462_v61 }
 0x5a9   :  { %1364 = vmatpush.msra.mxu0 %v1463_v14 }
 0x5ab   :  { %1365 = vmatpush.msra.mxu0 %v1464_v15 }
 0x5ad   :  { %1366 = vmatpush.msra.mxu0 %v1465_v16 }
 0x5af   :  { %1367 = vmatpush.msra.mxu0 %v1466_v17 }
 0x5b1   :  { %1368 = vmatpush.msra.mxu0 %v1467_v18 }
 0x5b3   :  { %1369 = vmatpush.msra.mxu0 %v1468_v21 }
 0x5b5   :  { %1370 = vmatpush.msra.mxu0 %v1469_v22 }
 0x5b7   :  { %1371 = vmatpush.msra.mxu0 %v1470_v24 }
 0x5b9   :  { %1372 = vmatpush.msra.mxu0 %v1471_v27 }
 0x5bb   :  { %1373 = vmatpush.msra.mxu0 %v1472_v28 }
 0x619   :  { %v979_v31 = vpop.f32.mrf.mxu0 }
 0x61a   :  { %v982_v32 = vmul.f32 0.001953125, %v979_v31 }
 0x61c   :  { %v983_v34 = vmul.f32 %v982_v32, %v982_v32 }
 0x61e   :  { %v985_v43 = vrot.slane %v983_v34, 7 }
 0x620   :  { %v987_v45 = vsub.f32 %v982_v32, %v985_v43 }
 0x622   :  { %v988_v47 = vmax.f32 %v987_v45, 0.0 }
 0x624   :  { %v989_v51 = vadd.f32 1e-05, %v988_v47 }
 0x626   :  { %1451 = vrsqrt.f32 %v989_v51  ;;  %vm996_vm12 = vweird.f32 %v989_v51 }
 0x62c   :  { %v1452_v53 = vpop.eup %1451 }
 0x62d   :  { %v991_v54 = vmul.f32 %v1452_v53, %v989_v51  ;;  %vm997_vm11 = vweird.f32 %v1452_v53 }
 0x62e   :  { %vm998_vm13 = vmor %vm996_vm12, %vm997_vm11 }
 0x62f   :  { %v992_v57 = vmul.f32 %v1452_v53, %v991_v54 }
 0x631   :  { %v993_v0 = vmul.f32 0.5, %v992_v57 }
 0x633   :  { %v994_v12 = vsub.f32 1.5, %v993_v0 }
 0x635   :  { %v995_v19 = vmul.f32 %v1452_v53, %v994_v12 }
 0x637   :  { %v999_v48 = vsel %vm998_vm13, %v1452_v53, %v995_v19 }
 0x638   :  { %1001 = vst [vmem:[#allocation1] sm:$0xff] %v999_v48 }
 0x63f   :  { %v1003_v49 = vld [vmem:[#allocation1 + $0x1] ss:$9 sm:$0xff] }
 0x640   :  { %v1005_v60 = vmul.f32 %v2469_v46, %v1003_v49 }
 0x642   :  { %v1006_v25 = vmul.f32 %v1005_v60, %v982_v32  ;;  %v1009_v26 = vperm.slane %v1005_v60, 0 }
 0x644   :  { %v1007_v33 = vsub.f32 %v2475_v20, %v1006_v25  ;;  %v1011_v35 = vmul.f32 %v1009_v26, %v2397_v5  ;;  %v1012_v39 = vmul.f32 %v1009_v26, %v2394_v3  ;;  %v1013_v58 = vmul.f32 %v1009_v26, %v2400_v10 }
 0x645   :  { %v1014_v13 = vmul.f32 %v1009_v26, %v2412_v37 }
 0x646   :  { %v1016_v38 = vperm.slane %v1007_v33, 0 }
 0x648   :  { %v1018_v40 = vadd.f32 %v1016_v38, %v1011_v35  ;;  %v1019_v1 = vadd.f32 %v1016_v38, %v1012_v39  ;;  %v1020_v4 = vadd.f32 %v1016_v38, %v1013_v58  ;;  %v1021_v41 = vadd.f32 %v1016_v38, %v1014_v13 }
 0x64a   :  { %v1022_v44 = vmax.f32 %v1018_v40, 0.0  ;;  %v1023_v23 = vmax.f32 %v1019_v1, 0.0  ;;  %v1024_v36 = vmax.f32 %v1020_v4, 0.0  ;;  %v1025_v63 = vmax.f32 %v1021_v41, 0.0 }
 0x64c   :  { %v1026_v52 = vadd.f32 %v1022_v44, %v2308_v6  ;;  %v1027_v8 = vadd.f32 %v1023_v23, %v2310_v9  ;;  %v1028_v5 = vadd.f32 %v1024_v36, %v2312_v29  ;;  %v1029_v3 = vadd.f32 %v1025_v63, %v2315_v11 }
 0x64e   :  { %1058 = vmatmul.f32.vlgmr.msra.gmra.mxu1 %v1026_v52  ;;  %1030 = vst [vmem:[#allocation2 + $0x1] sm:$0xff] %v1026_v52 }
 0x64f   :  { %1031 = vst [vmem:[#allocation2 + $0x9] sm:$0xff] %v1027_v8 }
 0x650   :  { %1032 = vst [vmem:[#allocation2 + $0x19] sm:$0xff] %v1028_v5 }
 0x651   :  { %1033 = vst [vmem:[#allocation2 + $0x21] sm:$0xff] %v1029_v3 }
 0x655   :  { %v1034_v10 = vld [vmem:[#allocation2] sm:$0xff] }
 0x656   :  { %1061 = vmatmul.f32.gmra.mxu1 %v1027_v8  ;;  %1087 = vmatmul.f32.vlgmr.msra.gmra.mxu2 %v1034_v10  ;;  %v1038_v37 = vld [vmem:[#allocation2 + $0x2] sm:$0xff]  ;;  %v1039_v42 = vld [vmem:[#allocation2 + $0xa] sm:$0xff] }
 0x657   :  { %1116 = vmatmul.f32.vlgmr.msra.gmra.mxu3 %v1038_v37  ;;  %v1035_v30 = vld [vmem:[#allocation2 + $0x8] sm:$0xff]  ;;  %v1036_v50 = vld [vmem:[#allocation2 + $0x18] sm:$0xff] }
 0x658   :  { %v1040_v55 = vld [vmem:[#allocation2 + $0x1a] sm:$0xff]  ;;  %v1041_v7 = vld [vmem:[#allocation2 + $0x22] sm:$0xff] }
 0x659   :  { %v1037_v56 = vld [vmem:[#allocation2 + $0x20] sm:$0xff] }
 0x65e   :  { %1064 = vmatmul.f32.gmra.mxu1 %v1028_v5  ;;  %1090 = vmatmul.f32.gmra.mxu2 %v1035_v30 }
 0x65f   :  { %1119 = vmatmul.f32.gmra.mxu3 %v1039_v42 }
 0x666   :  { %1067 = vmatmul.f32.gmra.mxu1 %v1029_v3  ;;  %1093 = vmatmul.f32.gmra.mxu2 %v1036_v50 }
 0x667   :  { %1122 = vmatmul.f32.gmra.mxu3 %v1040_v55 }
 0x66e   :  { %1096 = vmatmul.f32.gmra.mxu2 %v1037_v56 }
 0x66f   :  { %1125 = vmatmul.f32.gmra.mxu3 %v1041_v7 }
 0x6cb   :  { %v1059_v2 = vpop.f32.mrf.mxu1 }
 0x6d3   :  { %v1062_v14 = vpop.f32.mrf.mxu1 }
 0x6d9   :  { %v1088_v59 = vpop.f32.mrf.mxu2 }
 0x6da   :  { %v1117_v61 = vpop.f32.mrf.mxu3  ;;  %v1089_v21 = vadd.f32 %v1088_v59, %v1059_v2 }
 0x6db   :  { %v1065_v18 = vpop.f32.mrf.mxu1 }
 0x6dc   :  { %v1129_v31 = vadd.f32 %v1117_v61, %v1089_v21 }
 0x6de   :  { %v1133_v43 = vadd.f32 %v2391_v62, %v1129_v31 }
 0x6e0   :  { %v1146_v0 = vmul.f32 %v1133_v43, %v1133_v43 }
 0x6e1   :  { %v1091_v15 = vpop.f32.mrf.mxu2 }
 0x6e2   :  { %v1120_v16 = vpop.f32.mrf.mxu3  ;;  %v1092_v17 = vadd.f32 %v1091_v15, %v1062_v14 }
 0x6e3   :  { %v1068_v47 = vpop.f32.mrf.mxu1 }
 0x6e4   :  { %v1130_v24 = vadd.f32 %v1120_v16, %v1092_v17 }
 0x6e6   :  { %v1134_v34 = vadd.f32 %v2391_v62, %v1130_v24 }
 0x6e8   :  { %v1147_v53 = vmul.f32 %v1134_v34, %v1134_v34  ;;  %v1137_v12 = vadd.f32 %v1134_v34, %v1133_v43 }
 0x6e9   :  { %v1094_v22 = vpop.f32.mrf.mxu2 }
 0x6ea   :  { %v1095_v27 = vadd.f32 %v1094_v22, %v1065_v18  ;;  %v1123_v28 = vpop.f32.mrf.mxu3  ;;  %v1150_v49 = vadd.f32 %v1147_v53, %v1146_v0 }
 0x6ec   :  { %v1131_v32 = vadd.f32 %v1123_v28, %v1095_v27 }
 0x6ee   :  { %v1135_v45 = vadd.f32 %v2391_v62, %v1131_v32 }
 0x6f0   :  { %v1148_v19 = vmul.f32 %v1135_v45, %v1135_v45  ;;  %v1138_v60 = vadd.f32 %v1137_v12, %v1135_v45 }
 0x6f1   :  { %v1097_v51 = vpop.f32.mrf.mxu2 }
 0x6f2   :  { %v1098_v54 = vadd.f32 %v1097_v51, %v1068_v47  ;;  %v1126_v57 = vpop.f32.mrf.mxu3  ;;  %v1151_v26 = vadd.f32 %v1150_v49, %v1148_v19 }
 0x6f4   :  { %v1132_v48 = vadd.f32 %v1126_v57, %v1098_v54 }
 0x6f6   :  { %v1136_v25 = vadd.f32 %v2391_v62, %v1132_v48 }
 0x6f8   :  { %v1139_v33 = vadd.f32 %v1138_v60, %v1136_v25  ;;  %v1149_v35 = vmul.f32 %v1136_v25, %v1136_v25 }
 0x6fa   :  { %v1140_v38 = vrot.slane %v1139_v33, 4  ;;  %v1152_v39 = vadd.f32 %v1151_v26, %v1149_v35 }
 0x6fc   :  { %v1141_v58 = vadd.f32 %v1140_v38, %v1139_v33  ;;  %v1153_v13 = vrot.slane %v1152_v39, 4 }
 0x6fe   :  { %v1142_v40 = vrot.slane %v1141_v58, 2  ;;  %v1154_v1 = vadd.f32 %v1153_v13, %v1152_v39 }
 0x700   :  { %v1143_v4 = vadd.f32 %v1142_v40, %v1141_v58  ;;  %v1155_v41 = vrot.slane %v1154_v1, 2 }
 0x702   :  { %v1144_v44 = vrot.slane %v1143_v4, 1  ;;  %v1156_v23 = vadd.f32 %v1155_v41, %v1154_v1 }
 0x704   :  { %v1157_v36 = vrot.slane %v1156_v23, 1  ;;  %v1145_v63 = vadd.f32 %v1144_v44, %v1143_v4 }
 0x706   :  { %v1158_v52 = vadd.f32 %v1157_v36, %v1156_v23 }
 0x708   :  { %v1159_v8 = vsel %vm310_vm1, %v1145_v63, %v1158_v52 }
 0x709   :  { %1176 = vmatmul.f32.vlgmr.msrb.gmra.mxu0 %v1159_v8 }
 0x786   :  { %v1177_v5 = vpop.f32.mrf.mxu0 }
 0x787   :  { %v1180_v3 = vmul.f32 0.001953125, %v1177_v5 }
 0x789   :  { %v1181_v10 = vmul.f32 %v1180_v3, %v1180_v3 }
 0x78b   :  { %v1183_v37 = vrot.slane %v1181_v10, 7 }
 0x78d   :  { %v1185_v30 = vsub.f32 %v1180_v3, %v1183_v37 }
 0x78f   :  { %v1186_v42 = vmax.f32 %v1185_v30, 0.0 }
 0x791   :  { %v1187_v50 = vadd.f32 1e-05, %v1186_v42 }
 0x793   :  { %1453 = vrsqrt.f32 %v1187_v50  ;;  %vm1194_vm15 = vweird.f32 %v1187_v50 }
 0x799   :  { %v1454_v55 = vpop.eup %1453 }
 0x79a   :  { %v1189_v56 = vmul.f32 %v1454_v55, %v1187_v50  ;;  %vm1195_vm14 = vweird.f32 %v1454_v55 }
 0x79b   :  { %vm1196_vm0 = vmor %vm1194_vm15, %vm1195_vm14 }
 0x79c   :  { %v1190_v7 = vmul.f32 %v1454_v55, %v1189_v56 }
 0x79e   :  { %v1191_v2 = vmul.f32 0.5, %v1190_v7 }
 0x7a0   :  { %v1192_v59 = vsub.f32 1.5, %v1191_v2 }
 0x7a2   :  { %v1193_v61 = vmul.f32 %v1454_v55, %v1192_v59 }
 0x7a4   :  { %v1197_v14 = vsel %vm1196_vm0, %v1454_v55, %v1193_v61 }
 0x7a5   :  { %1199 = vst [vmem:[#allocation1] sm:$0xff] %v1197_v14 }
 0x7ac   :  { %v1201_v15 = vld [vmem:[#allocation1 + $0x1] ss:$9 sm:$0xff] }
 0x7ad   :  { %v1203_v16 = vmul.f32 %v2469_v46, %v1201_v15 }
 0x7af   :  { %v1204_v17 = vmul.f32 %v1203_v16, %v1180_v3  ;;  %v1207_v18 = vperm.slane %v1203_v16, 0 }
 0x7b1   :  { %v1205_v21 = vsub.f32 %v2475_v20, %v1204_v17  ;;  %v1209_v22 = vmul.f32 %v1207_v18, %v1133_v43  ;;  %v1210_v27 = vmul.f32 %v1207_v18, %v1134_v34  ;;  %v1211_v28 = vmul.f32 %v1207_v18, %v1135_v45 }
 0x7b2   :  { %v1212_v31 = vmul.f32 %v1207_v18, %v1136_v25 }
 0x7b3   :  { %v1214_v24 = vperm.slane %v1205_v21, 0 }
 0x7b5   :  { %v1216_v32 = vadd.f32 %v1214_v24, %v1209_v22  ;;  %v1217_v47 = vadd.f32 %v1214_v24, %v1210_v27  ;;  %v1218_v51 = vadd.f32 %v1214_v24, %v1211_v28  ;;  %v1219_v53 = vadd.f32 %v1214_v24, %v1212_v31 }
 0x7b7   :  { %v1220_v54 = vmax.f32 %v1216_v32, 0.0  ;;  %v1221_v57 = vmax.f32 %v1217_v47, 0.0  ;;  %v1222_v0 = vmax.f32 %v1218_v51, 0.0  ;;  %v1223_v12 = vmax.f32 %v1219_v53, 0.0 }
 0x7b9   :  { %v1224_v19 = vadd.f32 %v1220_v54, %v2308_v6  ;;  %v1225_v48 = vadd.f32 %v1221_v57, %v2310_v9  ;;  %v1226_v49 = vadd.f32 %v1222_v0, %v2312_v29  ;;  %v1227_v43 = vadd.f32 %v1223_v12, %v2315_v11 }
 0x7bb   :  { %1256 = vmatmul.f32.vlgmr.msrb.gmra.mxu1 %v1224_v19  ;;  %1228 = vst [vmem:[#allocation2 + $0x1] sm:$0xff] %v1224_v19 }
 0x7bc   :  { %1229 = vst [vmem:[#allocation2 + $0x9] sm:$0xff] %v1225_v48 }
 0x7bd   :  { %1230 = vst [vmem:[#allocation2 + $0x19] sm:$0xff] %v1226_v49 }
 0x7be   :  { %1231 = vst [vmem:[#allocation2 + $0x21] sm:$0xff] %v1227_v43 }
 0x7c2   :  { %v1232_v34 = vld [vmem:[#allocation2] sm:$0xff] }
 0x7c3   :  { %1259 = vmatmul.f32.gmra.mxu1 %v1225_v48  ;;  %1285 = vmatmul.f32.vlgmr.msrb.gmra.mxu2 %v1232_v34  ;;  %v1236_v45 = vld [vmem:[#allocation2 + $0x2] sm:$0xff]  ;;  %v1237_v6 = vld [vmem:[#allocation2 + $0xa] sm:$0xff] }
 0x7c4   :  { %1314 = vmatmul.f32.vlgmr.msrb.gmra.mxu3 %v1236_v45  ;;  %v1233_v60 = vld [vmem:[#allocation2 + $0x8] sm:$0xff]  ;;  %v1234_v9 = vld [vmem:[#allocation2 + $0x18] sm:$0xff] }
 0x7c5   :  { %v1238_v29 = vld [vmem:[#allocation2 + $0x1a] sm:$0xff]  ;;  %v1239_v25 = vld [vmem:[#allocation2 + $0x22] sm:$0xff] }
 0x7c6   :  { %v1235_v11 = vld [vmem:[#allocation2 + $0x20] sm:$0xff] }
 0x7cb   :  { %1262 = vmatmul.f32.gmra.mxu1 %v1226_v49  ;;  %1288 = vmatmul.f32.gmra.mxu2 %v1233_v60 }
 0x7cc   :  { %1317 = vmatmul.f32.gmra.mxu3 %v1237_v6 }
 0x7d3   :  { %1265 = vmatmul.f32.gmra.mxu1 %v1227_v43  ;;  %1291 = vmatmul.f32.gmra.mxu2 %v1234_v9 }
 0x7d4   :  { %1320 = vmatmul.f32.gmra.mxu3 %v1238_v29 }
 0x7db   :  { %1294 = vmatmul.f32.gmra.mxu2 %v1235_v11 }
 0x7dc   :  { %1323 = vmatmul.f32.gmra.mxu3 %v1239_v25 }
 0x838   :  { %v1257_v26 = vpop.f32.mrf.mxu1 }
 0x840   :  { %v1260_v38 = vpop.f32.mrf.mxu1 }
 0x846   :  { %v1286_v33 = vpop.f32.mrf.mxu2 }
 0x847   :  { %v1315_v35 = vpop.f32.mrf.mxu3  ;;  %v1287_v1 = vadd.f32 %v1286_v33, %v1257_v26 }
 0x848   :  { %v1263_v40 = vpop.f32.mrf.mxu1 }
 0x849   :  { %v1327_v36 = vadd.f32 %v1315_v35, %v1287_v1 }
 0x84b   :  { %v1331_v8 = vadd.f32 %v2391_v62, %v1327_v36 }
 0x84d   :  { %v1344_v50 = vmul.f32 %v1331_v8, %v1331_v8 }
 0x84e   :  { %v1289_v39 = vpop.f32.mrf.mxu2 }
 0x84f   :  { %v1318_v58 = vpop.f32.mrf.mxu3  ;;  %v1290_v13 = vadd.f32 %v1289_v39, %v1260_v38 }
 0x850   :  { %v1266_v3 = vpop.f32.mrf.mxu1 }
 0x851   :  { %v1328_v41 = vadd.f32 %v1318_v58, %v1290_v13 }
 0x853   :  { %v1332_v52 = vadd.f32 %v2391_v62, %v1328_v41 }
 0x855   :  { %v1345_v37 = vmul.f32 %v1332_v52, %v1332_v52  ;;  %v1335_v55 = vadd.f32 %v1332_v52, %v1331_v8 }
 0x856   :  { %v1292_v4 = vpop.f32.mrf.mxu2 }
 0x857   :  { %v1293_v44 = vadd.f32 %v1292_v4, %v1263_v40  ;;  %v1321_v23 = vpop.f32.mrf.mxu3  ;;  %v1348_v2 = vadd.f32 %v1345_v37, %v1344_v50 }
 0x859   :  { %v1329_v63 = vadd.f32 %v1321_v23, %v1293_v44 }
 0x85b   :  { %v1333_v5 = vadd.f32 %v2391_v62, %v1329_v63 }
 0x85d   :  { %v1346_v56 = vmul.f32 %v1333_v5, %v1333_v5  ;;  %v1336_v59 = vadd.f32 %v1335_v55, %v1333_v5 }
 0x85e   :  { %v1295_v10 = vpop.f32.mrf.mxu2 }
 0x85f   :  { %v1296_v30 = vadd.f32 %v1295_v10, %v1266_v3  ;;  %v1324_v42 = vpop.f32.mrf.mxu3  ;;  %v1349_v14 = vadd.f32 %v1348_v2, %v1346_v56 }
 0x861   :  { %v1330_v7 = vadd.f32 %v1324_v42, %v1296_v30 }
 0x863   :  { %v1334_v61 = vadd.f32 %v2391_v62, %v1330_v7 }
 0x865   :  { %v1337_v15 = vadd.f32 %v1336_v59, %v1334_v61  ;;  %v1347_v16 = vmul.f32 %v1334_v61, %v1334_v61 }
 0x867   :  { %v1338_v17 = vrot.slane %v1337_v15, 4  ;;  %v1350_v18 = vadd.f32 %v1349_v14, %v1347_v16 }
 0x869   :  { %v1339_v21 = vadd.f32 %v1338_v17, %v1337_v15  ;;  %v1351_v22 = vrot.slane %v1350_v18, 4 }
 0x86b   :  { %v1340_v24 = vrot.slane %v1339_v21, 2  ;;  %v1352_v27 = vadd.f32 %v1351_v22, %v1350_v18 }
 0x86d   :  { %v1341_v28 = vadd.f32 %v1340_v24, %v1339_v21  ;;  %v1353_v31 = vrot.slane %v1352_v27, 2 }
 0x86f   :  { %v1342_v32 = vrot.slane %v1341_v28, 1  ;;  %v1354_v47 = vadd.f32 %v1353_v31, %v1352_v27 }
 0x871   :  { %v1355_v51 = vrot.slane %v1354_v47, 1  ;;  %v1343_v53 = vadd.f32 %v1342_v32, %v1341_v28 }
 0x873   :  { %v1356_v54 = vadd.f32 %v1355_v51, %v1354_v47 }
 0x875   :  { %v1357_v57 = vsel %vm310_vm1, %v1343_v53, %v1356_v54 }
 0x876   :  { %1374 = vmatmul.f32.vlgmr.msra.gmra.mxu0 %v1357_v57 }
 0x8f3   :  { %v1375_v62 = vpop.f32.mrf.mxu0 }
 0x8f4   :  { %v1378_v0 = vmul.f32 0.001953125, %v1375_v62 }
 0x8f6   :  { %v1379_v12 = vmul.f32 %v1378_v0, %v1378_v0 }
 0x8f8   :  { %v1381_v19 = vrot.slane %v1379_v12, 7 }
 0x8fa   :  { %v1383_v48 = vsub.f32 %v1378_v0, %v1381_v19 }
 0x8fc   :  { %v1384_v49 = vmax.f32 %v1383_v48, 0.0 }
 0x8fe   :  { %v1385_v43 = vadd.f32 1e-05, %v1384_v49 }
 0x900   :  { %1455 = vrsqrt.f32 %v1385_v43  ;;  %vm1392_vm3 = vweird.f32 %v1385_v43 }
 0x906   :  { %v1456_v34 = vpop.eup %1455 }
 0x907   :  { %v1387_v45 = vmul.f32 %v1456_v34, %v1385_v43  ;;  %vm1393_vm2 = vweird.f32 %v1456_v34 }
 0x908   :  { %vm1394_vm4 = vmor %vm1392_vm3, %vm1393_vm2 }
 0x909   :  { %v1388_v60 = vmul.f32 %v1456_v34, %v1387_v45 }
 0x90b   :  { %v1389_v6 = vmul.f32 0.5, %v1388_v60 }
 0x90d   :  { %v1390_v9 = vsub.f32 1.5, %v1389_v6 }
 0x90f   :  { %v1391_v29 = vmul.f32 %v1456_v34, %v1390_v9 }
 0x911   :  { %v1395_v11 = vsel %vm1394_vm4, %v1456_v34, %v1391_v29 }
 0x912   :  { %1397 = vst [vmem:[#allocation1] sm:$0xff] %v1395_v11 }
 0x919   :  { %v1399_v25 = vld [vmem:[#allocation1 + $0x1] ss:$9 sm:$0xff] }
 0x91a   :  { %v1401_v26 = vmul.f32 %v2469_v46, %v1399_v25 }
 0x91c   :  { %v1402_v33 = vmul.f32 %v1401_v26, %v1378_v0  ;;  %v1405_v35 = vperm.slane %v1401_v26, 0 }
 0x91e   :  { %v1403_v38 = vsub.f32 %v2475_v20, %v1402_v33  ;;  %v1407_v39 = vmul.f32 %v1405_v35, %v1331_v8  ;;  %v1408_v58 = vmul.f32 %v1405_v35, %v1332_v52  ;;  %v1409_v13 = vmul.f32 %v1405_v35, %v1333_v5 }
 0x91f   :  { %v1410_v40 = vmul.f32 %v1405_v35, %v1334_v61 }
 0x920   :  { %v1412_v1 = vperm.slane %v1403_v38, 0 }
 0x922   :  { %v1414_v4 = vadd.f32 %v1412_v1, %v1407_v39  ;;  %v1415_v41 = vadd.f32 %v1412_v1, %v1408_v58  ;;  %v1416_v44 = vadd.f32 %v1412_v1, %v1409_v13  ;;  %v1417_v23 = vadd.f32 %v1412_v1, %v1410_v40 }
 0x924   :  { %v1418_v36 = vmax.f32 %v1414_v4, 0.0  ;;  %v1419_v63 = vmax.f32 %v1415_v41, 0.0  ;;  %v1420_v3 = vmax.f32 %v1416_v44, 0.0  ;;  %v1421_v10 = vmax.f32 %v1417_v23, 0.0 }
 0x926   :  { %1422 = vst [vmem:[%s2524_s8] sm:$0xff] %v1418_v36 }
 0x927   :  { %1423 = vst [vmem:[%s2524_s8 + $0x8] sm:$0xff] %v1419_v63 }
 0x928   :  { %1424 = vst [vmem:[%s2524_s8 + $0x10] sm:$0xff] %v1420_v3 }
 0x929   :  { %1425 = vst [vmem:[%s2524_s8 + $0x18] sm:$0xff] %v1421_v10 }
 0x92a   :  { %1430 = vsyncpa [#allocation4], 1 }

</bundles_post_ra>
